<compile_context>
chip_gen: v7x
topology: tpu7x:2x2x1
jax: 0.10.0
libtpu: 0.0.40
codegen_flags: <defaults>
</compile_context>

<pallas_src>
import functools

import jax
import jax.numpy as jnp
from jax import lax
from jax.experimental import pallas as pl
from jax.experimental.pallas import tpu as pltpu

LEAK = 0.95          # leaking_rate
INPUT_SCALE = 1.0
RHO = 0.95
DENSITY = 0.05


def _esn_group_kernel(u_ref, winbd_ref, wbd_ref, woutbd_ref, out_ref, *, T, N_b):
    """One grid step = one group of `cpb` channels packed 256-wide.

    u_ref      : (T*N_b, cpb*N_u)   bf16, rows time-major, cols channel-major
    winbd_ref  : (cpb*N_u, cpb*N_x) bf16 block-diag input weights
    wbd_ref    : (cpb*N_x, cpb*N_x) f32  block-diag recurrent weights
    woutbd_ref : (cpb*N_x, cpb*N_u) bf16 block-diag readout weights
    out_ref    : (N_b, cpb*N_u)     y_T for the whole group
    """
    # Input projection for the whole group, hoisted off the serial critical
    # path: one big bf16 MXU matmul instead of T tiny M=N_b matmuls.
    uproj = jnp.dot(u_ref[...], winbd_ref[...],
                    preferred_element_type=jnp.float32)       # (T*N_b, cpb*N_x)

    nx_grp = uproj.shape[-1]
    x = jnp.zeros((N_b, nx_grp), jnp.float32)

    # Fully-unrolled leaky-tanh recurrence.  The block-diagonal recurrent
    # weights make every time step ONE 256-wide MXU pass for the whole group.
    # wbd_ref is read inside the loop (a (256,256) f32 value is 64 vregs; a
    # pre-loop hoist would spill the entire register file onto the critical
    # path).  The uproj slices depend only on uproj, so the scheduler can
    # precompute them off the dependent chain.
    for t in range(T):
        pre = uproj[t * N_b:(t + 1) * N_b, :] + jnp.dot(
            x, wbd_ref[...], preferred_element_type=jnp.float32)
        x = (1.0 - LEAK) * x + LEAK * jnp.tanh(pre)
    # NOTE: explicit MXU staging (pltpu.matmul_push_rhs once, matmul_acc_lhs
    # per step) would avoid re-pushing the RHS every unrolled step, but the
    # explicit-MXU API is chip-specific (128- vs 256-wide staging); portable
    # jnp.dot is kept here.

    # Readout for the whole group: one lane-dense (N_b, cpb*N_u) store.
    out_ref[...] = jnp.dot(x.astype(jnp.bfloat16), woutbd_ref[...],
                           preferred_element_type=jnp.float32
                           ).astype(out_ref.dtype)


def _block_diag_groups(w, cpb):
    """(C, A, B) -> (C//cpb, cpb*A, cpb*B) block-diagonal per channel group."""
    C, A, B = w.shape
    G = C // cpb
    wg = w.reshape(G, cpb, A, B)
    out = jnp.zeros((G, cpb * A, cpb * B), w.dtype)
    for i in range(cpb):
        out = out.at[:, i * A:(i + 1) * A, i * B:(i + 1) * B].set(wg[:, i])
    return out


def pack_esn_params(win_t, w_t, wout_t, *, channels_per_block=2):
    """One-time packing of the per-channel ESN weights into the grouped
    block-diagonal layout consumed by the kernel (weights are static, so this
    happens outside the forward path).  Input / readout weights are stored in
    bf16 (native MXU width, halves their HBM traffic); the recurrent W stays
    f32 so the 8-step recurrence keeps full accuracy."""
    cpb = channels_per_block
    winbd = _block_diag_groups(win_t, cpb).astype(jnp.bfloat16)
    wbd = _block_diag_groups(w_t, cpb).astype(jnp.float32)
    woutbd = _block_diag_groups(wout_t, cpb).astype(jnp.bfloat16)
    return winbd, wbd, woutbd


def next_frame_prediction(data_in, winbd, wbd, woutbd, *, channels_per_block=2):
    """Equivalent of NextFramePredictionModule.forward."""
    N_b, T, C, H, W = data_in.shape
    N_u = H * W
    cpb = channels_per_block
    assert C % cpb == 0, (C, cpb)
    G = C // cpb
    N_x = wbd.shape[-1] // cpb

    # glue: (N_b,T,C,H,W) -> (T*N_b, C*H*W), time-major rows / channel-major
    # cols; single fused transpose+reshape+cast op.
    u = jnp.transpose(data_in, (1, 0, 2, 3, 4)).reshape(T * N_b, C * N_u)
    u = u.astype(jnp.bfloat16)

    kernel = functools.partial(_esn_group_kernel, T=T, N_b=N_b)

    out = pl.pallas_call(
        kernel,
        out_shape=jax.ShapeDtypeStruct((N_b, C * N_u), data_in.dtype),
        grid_spec=pltpu.PrefetchScalarGridSpec(
            num_scalar_prefetch=0,
            grid=(G,),
            in_specs=[
                # all frames of this channel group in one block
                pl.BlockSpec((T * N_b, cpb * N_u), lambda g: (0, g)),
                # per-group block-diagonal weights, loaded once per group
                pl.BlockSpec((None, cpb * N_u, cpb * N_x), lambda g: (g, 0, 0)),
                pl.BlockSpec((None, cpb * N_x, cpb * N_x), lambda g: (g, 0, 0)),
                pl.BlockSpec((None, cpb * N_x, cpb * N_u), lambda g: (g, 0, 0)),
            ],
            out_specs=pl.BlockSpec((N_b, cpb * N_u), lambda g: (0, g)),
        ),
        compiler_params=pltpu.CompilerParams(
            # channel groups are independent ESN pairs -> v7x megacore splits
            # the 2 grid steps across its 2 TensorCores (no-op on v5e/v6e).
            dimension_semantics=("parallel",)),
    )(u, winbd, wbd, woutbd)

    # glue: (N_b, C*H*W) -> (N_b, C, H, W) is a free contiguous reshape
    # (no output transpose: the kernel already wrote (batch, channel, pixel)).
    return out.reshape(N_b, C, H, W)


def init_esn_params(key, C, N_u, N_x):
    """Deterministic synthetic per-channel ESN parameters (no checkpoint)."""
    k_win, k_w, k_mask, k_wout = jax.random.split(key, 4)
    win_t = jax.random.uniform(k_win, (C, N_u, N_x), jnp.float32,
                               minval=-INPUT_SCALE, maxval=INPUT_SCALE)
    w = jax.random.uniform(k_w, (C, N_x, N_x), jnp.float32, minval=-1.0, maxval=1.0)
    w = w * (jax.random.uniform(k_mask, (C, N_x, N_x)) < DENSITY)

    # Approximate spectral-radius rescale via power iteration; ||W v|| of the
    # converged vector is used (approximate for complex dominant eigenpairs,
    # but this is synthetic-init glue and both kernel and reference use the
    # same resulting weights, so parity is unaffected).
    def spectral_radius(wc):
        v = jnp.ones((N_x,), jnp.float32) / jnp.sqrt(N_x)

        def body(_, v):
            v = wc @ v
            return v / (jnp.linalg.norm(v) + 1e-12)

        v = lax.fori_loop(0, 64, body, v)
        return jnp.linalg.norm(wc @ v) + 1e-12

    srs = jax.vmap(spectral_radius)(w)
    w_t = w * (RHO / srs)[:, None, None]

    # TODO(synk): Wout normally comes from the ridge-regression fit(); synthetic init here.
    wout_t = jax.random.normal(k_wout, (C, N_x, N_u), jnp.float32) / jnp.sqrt(N_x)
    return win_t, w_t, wout_t


def reference(data_in, win_t, w_t, wout_t):
    """Pure-JAX f32 reference of the same forward pass (sanity check)."""
    N_b, T, C, H, W = data_in.shape
    N_u = H * W
    u = jnp.transpose(data_in, (2, 1, 0, 3, 4)).reshape(C, T, N_b, N_u)

    def step(x, u_t):
        pre = (jnp.einsum('cbu,cux->cbx', u_t, win_t)
               + jnp.einsum('cbx,cxy->cby', x, w_t))
        return (1.0 - LEAK) * x + LEAK * jnp.tanh(pre), None

    x0 = jnp.zeros((C, N_b, win_t.shape[-1]), jnp.float32)
    xT, _ = lax.scan(step, x0, jnp.transpose(u, (1, 0, 2, 3)))
    out = jnp.einsum('cbx,cxu->cbu', xT, wout_t)
    return out.reshape(C, N_b, H, W).transpose(1, 0, 2, 3)


if __name__ == "__main__":
    # Small shapes consistent with the module: N_b=2, T=8, C=4, H=W=16;
    # node_num (N_x) = 128 (lane-aligned small stand-in for the default 500).
    N_b, T, C, H, W = 2, 8, 4, 16, 16
    N_u, N_x = H * W, 128

    key = jax.random.PRNGKey(0)
    k_data, k_params = jax.random.split(key)
    # Frames carry bf16-representable values (the precision the kernel's
    # input projection uses) stored as f32, so the f32 reference and the
    # bf16 kernel path see numerically identical inputs.
    data_in = jax.random.normal(k_data, (N_b, T, C, H, W), jnp.float32)
    data_in = data_in.astype(jnp.bfloat16).astype(jnp.float32)

    win_t, w_t, wout_t = init_esn_params(k_params, C, N_u, N_x)
    winbd, wbd, woutbd = pack_esn_params(win_t, w_t, wout_t, channels_per_block=2)

    out = next_frame_prediction(data_in, winbd, wbd, woutbd, channels_per_block=2)
    out = jax.block_until_ready(out)
    assert out.shape == (N_b, C, H, W), out.shape

    # Reference uses the same (bf16-rounded) input/readout weights the kernel
    # consumes, computed in plain f32; the recurrent W is f32 on both sides.
    win_bf = win_t.astype(jnp.bfloat16).astype(jnp.float32)
    wout_bf = wout_t.astype(jnp.bfloat16).astype(jnp.float32)
    ref = jax.block_until_ready(reference(data_in, win_bf, w_t, wout_bf))
    if not jnp.allclose(out, ref, atol=2e-2, rtol=2e-2):
        raise AssertionError("Pallas ESN output mismatch vs JAX reference")

    print("KERNEL_OK")
</pallas_src>

<mosaic_0001>
module attributes {stable_mosaic.version = 11 : i64} {
  func.func @_esn_group_kernel(%arg0: i32, %arg1: memref<16x512xbf16, #tpu.memory_space<vmem>>, %arg2: memref<1x512x256xbf16, #tpu.memory_space<vmem>>, %arg3: memref<1x256x256xf32, #tpu.memory_space<vmem>>, %arg4: memref<1x256x512xbf16, #tpu.memory_space<vmem>>, %arg5: memref<2x512xf32, #tpu.memory_space<vmem>>) attributes {dimension_semantics = [#tpu.dimension_semantics<parallel>], iteration_bounds = array<i64: 2>, scalar_prefetch = 0 : i64, scratch_operands = 0 : i64, tpu.core_type = #tpu.core_type<tc>, window_params = [{transform_indices = @transform_0, window_bounds = array<i64: 16, 512>}, {transform_indices = @transform_1, window_bounds = array<i64: 1, 512, 256>}, {transform_indices = @transform_2, window_bounds = array<i64: 1, 256, 256>}, {transform_indices = @transform_3, window_bounds = array<i64: 1, 256, 512>}, {transform_indices = @transform_4, window_bounds = array<i64: 2, 512>}]} {
    %c0 = arith.constant 0 : index
    %c0_0 = arith.constant 0 : index
    %0 = vector.load %arg1[%c0, %c0_0] : memref<16x512xbf16, #tpu.memory_space<vmem>>, vector<16x512xbf16>
    %c0_1 = arith.constant 0 : index
    %c0_2 = arith.constant 0 : index
    %c0_3 = arith.constant 0 : index
    %1 = vector.load %arg2[%c0_1, %c0_2, %c0_3] : memref<1x512x256xbf16, #tpu.memory_space<vmem>>, vector<1x512x256xbf16>
    %2 = vector.shape_cast %1 : vector<1x512x256xbf16> to vector<512x256xbf16>
    %cst = arith.constant dense<0.000000e+00> : vector<16x256xf32>
    %3 = tpu.matmul %0, %2, %cst {dimension_numbers = #tpu.dot_dimension_numbers<[1], [0], [0], [1], [0, 0, 1, 1], [], []>} : vector<16x512xbf16>, vector<512x256xbf16>, vector<16x256xf32> -> vector<16x256xf32>
    %cst_4 = arith.constant 0.000000e+00 : f32
    %4 = vector.broadcast %cst_4 : f32 to vector<2x256xf32>
    %5 = vector.extract_strided_slice %3 {offsets = [0, 0], sizes = [2, 256], strides = [1, 1]} : vector<16x256xf32> to vector<2x256xf32>
    %c0_5 = arith.constant 0 : index
    %c0_6 = arith.constant 0 : index
    %c0_7 = arith.constant 0 : index
    %6 = vector.load %arg3[%c0_5, %c0_6, %c0_7] : memref<1x256x256xf32, #tpu.memory_space<vmem>>, vector<1x256x256xf32>
    %7 = vector.shape_cast %6 : vector<1x256x256xf32> to vector<256x256xf32>
    %cst_8 = arith.constant dense<0.000000e+00> : vector<2x256xf32>
    %8 = tpu.matmul %4, %7, %cst_8 {dimension_numbers = #tpu.dot_dimension_numbers<[1], [0], [0], [1], [0, 0, 1, 1], [], []>} : vector<2x256xf32>, vector<256x256xf32>, vector<2x256xf32> -> vector<2x256xf32>
    %9 = arith.addf %5, %8 : vector<2x256xf32>
    %cst_9 = arith.constant 5.000000e-02 : f32
    %10 = vector.broadcast %cst_9 : f32 to vector<2x256xf32>
    %11 = arith.mulf %10, %4 : vector<2x256xf32>
    %12 = math.tanh %9 : vector<2x256xf32>
    %cst_10 = arith.constant 0.949999988 : f32
    %13 = vector.broadcast %cst_10 : f32 to vector<2x256xf32>
    %14 = arith.mulf %13, %12 : vector<2x256xf32>
    %15 = arith.addf %11, %14 : vector<2x256xf32>
    %16 = vector.extract_strided_slice %3 {offsets = [2, 0], sizes = [2, 256], strides = [1, 1]} : vector<16x256xf32> to vector<2x256xf32>
    %c0_11 = arith.constant 0 : index
    %c0_12 = arith.constant 0 : index
    %c0_13 = arith.constant 0 : index
    %17 = vector.load %arg3[%c0_11, %c0_12, %c0_13] : memref<1x256x256xf32, #tpu.memory_space<vmem>>, vector<1x256x256xf32>
    %18 = vector.shape_cast %17 : vector<1x256x256xf32> to vector<256x256xf32>
    %cst_14 = arith.constant dense<0.000000e+00> : vector<2x256xf32>
    %19 = tpu.matmul %15, %18, %cst_14 {dimension_numbers = #tpu.dot_dimension_numbers<[1], [0], [0], [1], [0, 0, 1, 1], [], []>} : vector<2x256xf32>, vector<256x256xf32>, vector<2x256xf32> -> vector<2x256xf32>
    %20 = arith.addf %16, %19 : vector<2x256xf32>
    %cst_15 = arith.constant 5.000000e-02 : f32
    %21 = vector.broadcast %cst_15 : f32 to vector<2x256xf32>
    %22 = arith.mulf %21, %15 : vector<2x256xf32>
    %23 = math.tanh %20 : vector<2x256xf32>
    %cst_16 = arith.constant 0.949999988 : f32
    %24 = vector.broadcast %cst_16 : f32 to vector<2x256xf32>
    %25 = arith.mulf %24, %23 : vector<2x256xf32>
    %26 = arith.addf %22, %25 : vector<2x256xf32>
    %27 = vector.extract_strided_slice %3 {offsets = [4, 0], sizes = [2, 256], strides = [1, 1]} : vector<16x256xf32> to vector<2x256xf32>
    %c0_17 = arith.constant 0 : index
    %c0_18 = arith.constant 0 : index
    %c0_19 = arith.constant 0 : index
    %28 = vector.load %arg3[%c0_17, %c0_18, %c0_19] : memref<1x256x256xf32, #tpu.memory_space<vmem>>, vector<1x256x256xf32>
    %29 = vector.shape_cast %28 : vector<1x256x256xf32> to vector<256x256xf32>
    %cst_20 = arith.constant dense<0.000000e+00> : vector<2x256xf32>
    %30 = tpu.matmul %26, %29, %cst_20 {dimension_numbers = #tpu.dot_dimension_numbers<[1], [0], [0], [1], [0, 0, 1, 1], [], []>} : vector<2x256xf32>, vector<256x256xf32>, vector<2x256xf32> -> vector<2x256xf32>
    %31 = arith.addf %27, %30 : vector<2x256xf32>
    %cst_21 = arith.constant 5.000000e-02 : f32
    %32 = vector.broadcast %cst_21 : f32 to vector<2x256xf32>
    %33 = arith.mulf %32, %26 : vector<2x256xf32>
    %34 = math.tanh %31 : vector<2x256xf32>
    %cst_22 = arith.constant 0.949999988 : f32
    %35 = vector.broadcast %cst_22 : f32 to vector<2x256xf32>
    %36 = arith.mulf %35, %34 : vector<2x256xf32>
    %37 = arith.addf %33, %36 : vector<2x256xf32>
    %38 = vector.extract_strided_slice %3 {offsets = [6, 0], sizes = [2, 256], strides = [1, 1]} : vector<16x256xf32> to vector<2x256xf32>
    %c0_23 = arith.constant 0 : index
    %c0_24 = arith.constant 0 : index
    %c0_25 = arith.constant 0 : index
    %39 = vector.load %arg3[%c0_23, %c0_24, %c0_25] : memref<1x256x256xf32, #tpu.memory_space<vmem>>, vector<1x256x256xf32>
    %40 = vector.shape_cast %39 : vector<1x256x256xf32> to vector<256x256xf32>
    %cst_26 = arith.constant dense<0.000000e+00> : vector<2x256xf32>
    %41 = tpu.matmul %37, %40, %cst_26 {dimension_numbers = #tpu.dot_dimension_numbers<[1], [0], [0], [1], [0, 0, 1, 1], [], []>} : vector<2x256xf32>, vector<256x256xf32>, vector<2x256xf32> -> vector<2x256xf32>
    %42 = arith.addf %38, %41 : vector<2x256xf32>
    %cst_27 = arith.constant 5.000000e-02 : f32
    %43 = vector.broadcast %cst_27 : f32 to vector<2x256xf32>
    %44 = arith.mulf %43, %37 : vector<2x256xf32>
    %45 = math.tanh %42 : vector<2x256xf32>
    %cst_28 = arith.constant 0.949999988 : f32
    %46 = vector.broadcast %cst_28 : f32 to vector<2x256xf32>
    %47 = arith.mulf %46, %45 : vector<2x256xf32>
    %48 = arith.addf %44, %47 : vector<2x256xf32>
    %49 = vector.extract_strided_slice %3 {offsets = [8, 0], sizes = [2, 256], strides = [1, 1]} : vector<16x256xf32> to vector<2x256xf32>
    %c0_29 = arith.constant 0 : index
    %c0_30 = arith.constant 0 : index
    %c0_31 = arith.constant 0 : index
    %50 = vector.load %arg3[%c0_29, %c0_30, %c0_31] : memref<1x256x256xf32, #tpu.memory_space<vmem>>, vector<1x256x256xf32>
    %51 = vector.shape_cast %50 : vector<1x256x256xf32> to vector<256x256xf32>
    %cst_32 = arith.constant dense<0.000000e+00> : vector<2x256xf32>
    %52 = tpu.matmul %48, %51, %cst_32 {dimension_numbers = #tpu.dot_dimension_numbers<[1], [0], [0], [1], [0, 0, 1, 1], [], []>} : vector<2x256xf32>, vector<256x256xf32>, vector<2x256xf32> -> vector<2x256xf32>
    %53 = arith.addf %49, %52 : vector<2x256xf32>
    %cst_33 = arith.constant 5.000000e-02 : f32
    %54 = vector.broadcast %cst_33 : f32 to vector<2x256xf32>
    %55 = arith.mulf %54, %48 : vector<2x256xf32>
    %56 = math.tanh %53 : vector<2x256xf32>
    %cst_34 = arith.constant 0.949999988 : f32
    %57 = vector.broadcast %cst_34 : f32 to vector<2x256xf32>
    %58 = arith.mulf %57, %56 : vector<2x256xf32>
    %59 = arith.addf %55, %58 : vector<2x256xf32>
    %60 = vector.extract_strided_slice %3 {offsets = [10, 0], sizes = [2, 256], strides = [1, 1]} : vector<16x256xf32> to vector<2x256xf32>
    %c0_35 = arith.constant 0 : index
    %c0_36 = arith.constant 0 : index
    %c0_37 = arith.constant 0 : index
    %61 = vector.load %arg3[%c0_35, %c0_36, %c0_37] : memref<1x256x256xf32, #tpu.memory_space<vmem>>, vector<1x256x256xf32>
    %62 = vector.shape_cast %61 : vector<1x256x256xf32> to vector<256x256xf32>
    %cst_38 = arith.constant dense<0.000000e+00> : vector<2x256xf32>
    %63 = tpu.matmul %59, %62, %cst_38 {dimension_numbers = #tpu.dot_dimension_numbers<[1], [0], [0], [1], [0, 0, 1, 1], [], []>} : vector<2x256xf32>, vector<256x256xf32>, vector<2x256xf32> -> vector<2x256xf32>
    %64 = arith.addf %60, %63 : vector<2x256xf32>
    %cst_39 = arith.constant 5.000000e-02 : f32
    %65 = vector.broadcast %cst_39 : f32 to vector<2x256xf32>
    %66 = arith.mulf %65, %59 : vector<2x256xf32>
    %67 = math.tanh %64 : vector<2x256xf32>
    %cst_40 = arith.constant 0.949999988 : f32
    %68 = vector.broadcast %cst_40 : f32 to vector<2x256xf32>
    %69 = arith.mulf %68, %67 : vector<2x256xf32>
    %70 = arith.addf %66, %69 : vector<2x256xf32>
    %71 = vector.extract_strided_slice %3 {offsets = [12, 0], sizes = [2, 256], strides = [1, 1]} : vector<16x256xf32> to vector<2x256xf32>
    %c0_41 = arith.constant 0 : index
    %c0_42 = arith.constant 0 : index
    %c0_43 = arith.constant 0 : index
    %72 = vector.load %arg3[%c0_41, %c0_42, %c0_43] : memref<1x256x256xf32, #tpu.memory_space<vmem>>, vector<1x256x256xf32>
    %73 = vector.shape_cast %72 : vector<1x256x256xf32> to vector<256x256xf32>
    %cst_44 = arith.constant dense<0.000000e+00> : vector<2x256xf32>
    %74 = tpu.matmul %70, %73, %cst_44 {dimension_numbers = #tpu.dot_dimension_numbers<[1], [0], [0], [1], [0, 0, 1, 1], [], []>} : vector<2x256xf32>, vector<256x256xf32>, vector<2x256xf32> -> vector<2x256xf32>
    %75 = arith.addf %71, %74 : vector<2x256xf32>
    %cst_45 = arith.constant 5.000000e-02 : f32
    %76 = vector.broadcast %cst_45 : f32 to vector<2x256xf32>
    %77 = arith.mulf %76, %70 : vector<2x256xf32>
    %78 = math.tanh %75 : vector<2x256xf32>
    %cst_46 = arith.constant 0.949999988 : f32
    %79 = vector.broadcast %cst_46 : f32 to vector<2x256xf32>
    %80 = arith.mulf %79, %78 : vector<2x256xf32>
    %81 = arith.addf %77, %80 : vector<2x256xf32>
    %82 = vector.extract_strided_slice %3 {offsets = [14, 0], sizes = [2, 256], strides = [1, 1]} : vector<16x256xf32> to vector<2x256xf32>
    %c0_47 = arith.constant 0 : index
    %c0_48 = arith.constant 0 : index
    %c0_49 = arith.constant 0 : index
    %83 = vector.load %arg3[%c0_47, %c0_48, %c0_49] : memref<1x256x256xf32, #tpu.memory_space<vmem>>, vector<1x256x256xf32>
    %84 = vector.shape_cast %83 : vector<1x256x256xf32> to vector<256x256xf32>
    %cst_50 = arith.constant dense<0.000000e+00> : vector<2x256xf32>
    %85 = tpu.matmul %81, %84, %cst_50 {dimension_numbers = #tpu.dot_dimension_numbers<[1], [0], [0], [1], [0, 0, 1, 1], [], []>} : vector<2x256xf32>, vector<256x256xf32>, vector<2x256xf32> -> vector<2x256xf32>
    %86 = arith.addf %82, %85 : vector<2x256xf32>
    %cst_51 = arith.constant 5.000000e-02 : f32
    %87 = vector.broadcast %cst_51 : f32 to vector<2x256xf32>
    %88 = arith.mulf %87, %81 : vector<2x256xf32>
    %89 = math.tanh %86 : vector<2x256xf32>
    %cst_52 = arith.constant 0.949999988 : f32
    %90 = vector.broadcast %cst_52 : f32 to vector<2x256xf32>
    %91 = arith.mulf %90, %89 : vector<2x256xf32>
    %92 = arith.addf %88, %91 : vector<2x256xf32>
    %93 = arith.truncf %92 : vector<2x256xf32> to vector<2x256xbf16>
    %c0_53 = arith.constant 0 : index
    %c0_54 = arith.constant 0 : index
    %c0_55 = arith.constant 0 : index
    %94 = vector.load %arg4[%c0_53, %c0_54, %c0_55] : memref<1x256x512xbf16, #tpu.memory_space<vmem>>, vector<1x256x512xbf16>
    %95 = vector.shape_cast %94 : vector<1x256x512xbf16> to vector<256x512xbf16>
    %cst_56 = arith.constant dense<0.000000e+00> : vector<2x512xf32>
    %96 = tpu.matmul %93, %95, %cst_56 {dimension_numbers = #tpu.dot_dimension_numbers<[1], [0], [0], [1], [0, 0, 1, 1], [], []>} : vector<2x256xbf16>, vector<256x512xbf16>, vector<2x512xf32> -> vector<2x512xf32>
    %c0_57 = arith.constant 0 : index
    %c0_58 = arith.constant 0 : index
    %97 = vector.load %arg5[%c0_57, %c0_58] : memref<2x512xf32, #tpu.memory_space<vmem>>, vector<2x512xf32>
    tpu.vector_store %arg5[%c0_57, %c0_58], %96 {strides = array<i32>} : memref<2x512xf32, #tpu.memory_space<vmem>>, vector<2x512xf32>,
    return
  }
  func.func @transform_0(%arg0: i32) -> (i32, i32) {
    %c0_i32 = arith.constant 0 : i32
    %c0_i32_0 = arith.constant 0 : i32
    return %c0_i32, %arg0 : i32, i32
  }
  func.func @transform_1(%arg0: i32) -> (i32, i32, i32) {
    %c0_i32 = arith.constant 0 : i32
    %c0_i32_0 = arith.constant 0 : i32
    %c0_i32_1 = arith.constant 0 : i32
    return %arg0, %c0_i32, %c0_i32_0 : i32, i32, i32
  }
  func.func @transform_2(%arg0: i32) -> (i32, i32, i32) {
    %c0_i32 = arith.constant 0 : i32
    %c0_i32_0 = arith.constant 0 : i32
    %c0_i32_1 = arith.constant 0 : i32
    return %arg0, %c0_i32, %c0_i32_0 : i32, i32, i32
  }
  func.func @transform_3(%arg0: i32) -> (i32, i32, i32) {
    %c0_i32 = arith.constant 0 : i32
    %c0_i32_0 = arith.constant 0 : i32
    %c0_i32_1 = arith.constant 0 : i32
    return %arg0, %c0_i32, %c0_i32_0 : i32, i32, i32
  }
  func.func @transform_4(%arg0: i32) -> (i32, i32) {
    %c0_i32 = arith.constant 0 : i32
    %c0_i32_0 = arith.constant 0 : i32
    return %c0_i32, %arg0 : i32, i32
  }
}

</mosaic_0001>

<bundles_post_ra>
// kernel: tpu_custom_call.1
= control target key start
LH: loop header
LB: loop body
LE: loop exit
PB: predicated region body
PF: predicated region fallthrough
CT: control target
= control target key end

     0   :  { %s4312_s0 = inlined_call_operand.hbm [shape: bf16[16,1024], index: 0, kind: input, shape index: {}]   ;;  %s4313_s1 = inlined_call_operand.hbm [shape: bf16[2,512,256], index: 1, kind: input, shape index: {}]   ;;  %s4314_s2 = inlined_call_operand.hbm [shape: f32[2,256,256], index: 2, kind: input, shape index: {}]   ;;  %s4315_s3 = inlined_call_operand.hbm [shape: bf16[2,256,512], index: 3, kind: input, shape index: {}]   ;;  %s4316_s4 = inlined_call_operand.hbm [shape: f32[2,1024], index: 4, kind: output, shape index: {}]  }
   0x1   :  { %4320 = sst [smem:[#allocation17_spill]] %s4312_s0 }
   0x2   :  { %4321 = sst [smem:[#allocation18_spill]] %s4313_s1 }
   0x3   :  { %9 = vsyncpa [#allocation3], 0 }
   0x4   :  { %11 = vsyncpa [#allocation3 + $0x1], 0 }
   0x5   :  { %12 = vsyncpa [#allocation6], 0 }
   0x6   :  { %14 = vsyncpa [#allocation6 + $0x1], 0 }
   0x7   :  { %15 = vsyncpa [#allocation9], 0 }
   0x8   :  { %17 = vsyncpa [#allocation9 + $0x1], 0 }
   0x9   :  { %18 = vsyncpa [#allocation4], 0 }
   0xa   :  { %20 = vsyncpa [#allocation4 + $0x1], 0  ;;  %s3463_s15 = smov 0   ;;  %s3465_s16 = smov 0  }
   0xb   :  { %s3467_s17 = smov 0   ;;  %s3469_s18 = smov 0  }
   0xc LB: > { %4322 = sst [smem:[#allocation15_spill]] %s3420_s17  ;;  %s3484_s19 = sadd.s32 4294967295, %s3424_s18   ;;  %s3424_s18 = sphi %s3469_s18, %s4342_s18   ;;  %s3420_s17 = sphi %s3467_s17, %s4339_s17   ;;  %s3416_s16 = sphi %s3465_s16, %s4341_s16   ;;  %s3412_s15 = sphi %s3463_s15, %s4340_s15  }
   0xd   : > { %s2253_s20 = sadd.s32 4294967294, %s3424_s18   ;;  %s3488_s21 = sadd.s32 1, %s3424_s18  }
   0xe   : > { %s33_s22 = sadd.s32 1, %s3420_s17  ;;  %s30_s23 = ssub.s32 %s3424_s18, %s3488_s21 }
   0xf   : > { %p40_p0 = scmp.ne.s32.totalorder %s3420_s17, %s3416_s16  ;;  %p31_p1 = scmp.eq.s32.totalorder %s30_s23, 0 }
  0x10   : > { %p41_p2 = scmp.eq.s32.totalorder %s3424_s18, 0  ;;  %p46_p3 = scmp.ne.s32.totalorder %s3416_s16, %s3412_s15 }
  0x11   : > { %p47_p4 = scmp.eq.s32.totalorder %s3484_s19, 0  ;;  %p148_p7 = scmp.eq.s32.totalorder %s3484_s19, 1 }
  0x12   : > { %s3500_s24 = scalar_select %p31_p1, %s3420_s17, %s33_s22  }
  0x13   : > { %p42_p5 = por %p41_p2, %p40_p0  ;;  %p3502_p6 = por %p47_p4, %p46_p3 }
  0x14   : > { %4323 = sst [smem:[#allocation16_spill]] %s3500_s24  ;;  %p154_p8 = scmp.eq.s32.totalorder %s2253_s20, 1 }
  0x15   : > { %s4324_s25 = scalar_select %p3502_p6, 1, 0 }
  0x16   : > { %p2959_p10 = scmp.lt.s32.totalorder %s3424_s18, 2  ;;  %p3509_p11 = por %p148_p7, %p40_p0 }
  0x17   : > { %p3513_p12 = por %p154_p8, %p46_p3  ;;  %s3518_s28 = sand.u32 1, %s3420_s17  }
  0x18   : > { %s4325_s26 = scalar_select %p3509_p11, 1, 0 }
  0x19   : > { %s4326_s27 = scalar_select %p3513_p12, 1, 0 }
  0x1a   : > { %p3520_p13 = pnand %p2959_p10, %p42_p5  ;;  %s195_s30 = sand.u32 1, %s3424_s18  }
  0x1b   : > { %s3526_s5 = sshll.u32 %s3518_s28, 9  ;;  %s3529_s6 = sshll.u32 %s3424_s18, 13 }
  0x1c   : > { %s4328_s1 = sld [smem:[#allocation18_spill]]  ;;  %s199_s10 = scalar_lea.vmem [#allocation5], %s3526_s5 }
  0x1d   : > { %s206_s11 = sshll.u32 %s199_s10, 4  ;;  %s3541_s12 = scalar_lea.sflag [#allocation6], %s195_s30  ;;  %s3538_s11 = int_to_ptr.vmem [resolvable:$true] %s206_s11 }
  0x1e   : > { %p3547_p2 = pneg %p3520_p13 }
  0x22   : > { %s3535_s9 = scalar_lea.hbm %s4328_s1, %s3529_s6  ;;  %s3235_s23 = scalar_lea.hbm %s4328_s1, 16384 }
  0x23   : > { %s3230_s13 = scalar_lea.hbm %s3535_s9, 8192  ;;  %p3236_p5 = scmp.lt.u32.totalorder %s3535_s9, %s4328_s1 }
  0x24   : > { %p3231_p1 = scmp.ne.s32.totalorder %s3535_s9, %s3230_s13  ;;  %p3237_p7 = scmp.lt.u32.totalorder %s3235_s23, %s3230_s13 }
  0x25   : > { %p3239_p10 = scmp.lt.u32.totalorder %s3230_s13, %s3535_s9 }
  0x26   : > { %p3233_p3 = pnand %p3547_p2, %p3231_p1  ;;  %p3238_p8 = por %p3237_p7, %p3236_p5 }
  0x28   : > { %p3234_p4 = pneg %p3233_p3  ;;  %p3240_p9 = por %p3239_p10, %p3238_p8 }
  0x2a   : > { %p3241_p0 = pnand %p3240_p9, %p3234_p4 }
  0x2c   : > { %3244 = shalt.err (!%p3241_p0)
}
  0x2d   : > { %s3245_s30 = scalar_lea.vmem %s3538_s11, 8192  ;;  %s3426_s10 = smov [#allocation5]  }
  0x2e   : > { %p3246_p1 = scmp.ne.s32.totalorder %s3538_s11, %s3245_s30  ;;  %s3250_s20 = sshll.u32 %s3426_s10, 4  ;;  %s3251_s20 = int_to_ptr.vmem [resolvable:$false] %s3250_s20 }
  0x2f   : > { %s3252_s22 = scalar_lea.vmem %s3251_s20, 16384  ;;  %p3253_p11 = scmp.lt.s32.totalorder %s3538_s11, %s3251_s20 }
  0x30   : > { %p3248_p3 = pnand %p3246_p1, %p3547_p2  ;;  %p3254_p6 = scmp.lt.s32.totalorder %s3252_s22, %s3245_s30 }
  0x32   : > { %p3249_p12 = pneg %p3248_p3  ;;  %p3255_p5 = por %p3254_p6, %p3253_p11 }
  0x34   : > { %p3256_p7 = pnand %p3255_p5, %p3249_p12 }
  0x36   : > { %3259 = shalt.err (!%p3256_p7)
}
  0x37   : > { %s3427_s13 = smov 128   ;;  %s3428_s23 = smov 8  }
  0x38   : > { %2948 = dma.hbm_to_vmem [thread:$0]  (!%p3520_p13), %s3535_s9, 8192, %s3538_s11, %s3541_s12, %s3427_s13, %s3427_s13, %s3428_s23  }
  0x39   : > { %p256_p9 = scmp.lt.s32.totalorder %s3424_s18, 3  ;;  %s2256_s7 = sshll.u32 %s3518_s28, 5 }
  0x3a   : > { %s2411_s8 = sshll.u32 %s3424_s18, 8  ;;  %p4330_p6 = scmp.ge.s32.totalorder %s3424_s18, 1 }
  0x3b   : > { %s4332_s0 = sld [smem:[#allocation17_spill]]  ;;  %s178_s1 = scalar_lea.vmem [#allocation2], %s2256_s7 }
  0x3c   : > { %p3576_p11 = pnand %p4330_p6, %p256_p9  ;;  %s185_s24 = sshll.u32 %s178_s1, 4  ;;  %s3585_s24 = int_to_ptr.vmem [resolvable:$true] %s185_s24 }
  0x3d   : > { %s175_s9 = scalar_lea.sflag [#allocation3], %s3518_s28 }
  0x3e   : > { %s4331_s30 = scalar_select %p3576_p11, 1, 0 }
  0x41   : > { %s3583_s22 = scalar_lea.hbm %s4332_s0, %s2411_s8  ;;  %s3265_s10 = scalar_lea.hbm %s4332_s0, 1024 }
  0x42   : > { %s3260_s11 = scalar_lea.hbm %s3583_s22, 512  ;;  %p3266_p8 = scmp.lt.u32.totalorder %s3583_s22, %s4332_s0 }
  0x43   : > { %p3261_p12 = scmp.ne.s32.totalorder %s3583_s22, %s3260_s11  ;;  %p3267_p10 = scmp.lt.u32.totalorder %s3265_s10, %s3260_s11 }
  0x44   : > { %p3269_p3 = scmp.lt.u32.totalorder %s3260_s11, %s3583_s22 }
  0x45   : > { %p3263_p0 = pnand %p3261_p12, %p3547_p2  ;;  %p3268_p1 = por %p3267_p10, %p3266_p8 }
  0x47   : > { %p3264_p4 = pneg %p3263_p0  ;;  %p3270_p5 = por %p3269_p3, %p3268_p1 }
  0x49   : > { %p3271_p7 = pnand %p3270_p5, %p3264_p4 }
  0x4b   : > { %3274 = shalt.err (!%p3271_p7)
}
  0x4c   : > { %s3275_s1 = scalar_lea.vmem %s3585_s24, 512  ;;  %s3429_s7 = smov [#allocation2]  }
  0x4d   : > { %p3276_p9 = scmp.ne.s32.totalorder %s3585_s24, %s3275_s1  ;;  %s3280_s13 = sshll.u32 %s3429_s7, 4  ;;  %s3281_s13 = int_to_ptr.vmem [resolvable:$false] %s3280_s13 }
  0x4e   : > { %s3282_s23 = scalar_lea.vmem %s3281_s13, 1024  ;;  %p3283_p0 = scmp.lt.s32.totalorder %s3585_s24, %s3281_s13 }
  0x4f   : > { %p3278_p6 = pnand %p3276_p9, %p3547_p2  ;;  %p3284_p11 = scmp.lt.s32.totalorder %s3282_s23, %s3275_s1 }
  0x51   : > { %p3279_p12 = pneg %p3278_p6  ;;  %p3285_p8 = por %p3284_p11, %p3283_p0 }
  0x53   : > { %p3286_p10 = pnand %p3285_p8, %p3279_p12 }
  0x55   : > { %3289 = shalt.err (!%p3286_p10)
}
  0x56   : > { %s3430_s11 = smov 512   ;;  %s3431_s10 = smov 256  }
  0x57   : > { %s3432_s8 = smov 16   ;;  %s3617_s7 = scalar_lea.hbm %s4314_s2, %s3529_s6 }
  0x58   : > { %2945 = dma.hbm_to_vmem [thread:$0]  (!%p3520_p13), %s3583_s22, 512, %s3585_s24, %s175_s9, %s3430_s11, %s3431_s10, %s3432_s8  }
  0x59   : > { %s220_s13 = scalar_lea.vmem [#allocation7], %s3526_s5  ;;  %s3290_s0 = scalar_lea.hbm %s3617_s7, 8192 }
  0x5a   : > { %s227_s23 = sshll.u32 %s220_s13, 4  ;;  %p3291_p11 = scmp.ne.s32.totalorder %s3617_s7, %s3290_s0  ;;  %s3620_s23 = int_to_ptr.vmem [resolvable:$true] %s227_s23 }
  0x5b   : > { %s3295_s22 = scalar_lea.hbm %s4314_s2, 16384  ;;  %p3296_p3 = scmp.lt.u32.totalorder %s3617_s7, %s4314_s2 }
  0x5c   : > { %p3293_p4 = pnand %p3291_p11, %p3547_p2  ;;  %p3297_p5 = scmp.lt.u32.totalorder %s3295_s22, %s3290_s0 }
  0x5d   : > { %p3299_p9 = scmp.lt.u32.totalorder %s3290_s0, %s3617_s7 }
  0x5e   : > { %p3294_p1 = pneg %p3293_p4  ;;  %p3298_p7 = por %p3297_p5, %p3296_p3 }
  0x60   : > { %p3300_p6 = por %p3299_p9, %p3298_p7 }
  0x62   : > { %p3301_p12 = pnand %p3300_p6, %p3294_p1 }
  0x64   : > { %3304 = shalt.err (!%p3301_p12)
}
  0x65   : > { %s3305_s20 = scalar_lea.vmem %s3620_s23, 8192  ;;  %s3433_s17 = smov [#allocation7]  }
  0x66   : > { %p3306_p0 = scmp.ne.s32.totalorder %s3620_s23, %s3305_s20  ;;  %s3310_s1 = sshll.u32 %s3433_s17, 4  ;;  %s3311_s1 = int_to_ptr.vmem [resolvable:$false] %s3310_s1 }
  0x67   : > { %s3312_s13 = scalar_lea.vmem %s3311_s1, 16384  ;;  %p3313_p11 = scmp.lt.s32.totalorder %s3620_s23, %s3311_s1 }
  0x68   : > { %p3308_p8 = pnand %p3306_p0, %p3547_p2  ;;  %p3314_p4 = scmp.lt.s32.totalorder %s3312_s13, %s3305_s20 }
  0x6a   : > { %p3309_p10 = pneg %p3308_p8  ;;  %p3315_p3 = por %p3314_p4, %p3313_p11 }
  0x6c   : > { %p3316_p5 = pnand %p3315_p3, %p3309_p10 }
  0x6e   : > { %3319 = shalt.err (!%p3316_p5)
}
  0x6f   : > { %2951 = dma.hbm_to_vmem [thread:$0]  (!%p3520_p13), %s3617_s7, 8192, %s3620_s23, %s3541_s12, %s3431_s10, %s3431_s10, %s3432_s8  }
  0x70   : > { %s3651_s22 = scalar_lea.hbm %s4315_s3, %s3529_s6  ;;  %s241_s9 = scalar_lea.vmem [#allocation8], %s3526_s5 }
  0x71   : > { %s248_s11 = sshll.u32 %s241_s9, 4  ;;  %s238_s20 = scalar_lea.sflag [#allocation9], %s3518_s28  ;;  %s3654_s11 = int_to_ptr.vmem [resolvable:$true] %s248_s11 }
  0x72   : > { %s3320_s17 = scalar_lea.hbm %s3651_s22, 8192  ;;  %s3325_s23 = scalar_lea.hbm %s4315_s3, 16384 }
  0x73   : > { %p3321_p1 = scmp.ne.s32.totalorder %s3651_s22, %s3320_s17  ;;  %p3326_p6 = scmp.lt.u32.totalorder %s3651_s22, %s4315_s3 }
  0x74   : > { %p3327_p12 = scmp.lt.u32.totalorder %s3325_s23, %s3320_s17  ;;  %p3329_p8 = scmp.lt.u32.totalorder %s3320_s17, %s3651_s22 }
  0x75   : > { %p3323_p7 = pnand %p3321_p1, %p3547_p2 }
  0x76   : > { %p3328_p0 = por %p3327_p12, %p3326_p6 }
  0x77   : > { %p3324_p9 = pneg %p3323_p7 }
  0x78   : > { %p3330_p10 = por %p3329_p8, %p3328_p0 }
  0x7a   : > { %p3331_p11 = pnand %p3330_p10, %p3324_p9 }
  0x7c   : > { %3334 = shalt.err (!%p3331_p11)
}
  0x7d   : > { %s3335_s5 = scalar_lea.vmem %s3654_s11, 8192  ;;  %s3434_s13 = smov [#allocation8]  }
  0x7e   : > { %p3336_p4 = scmp.ne.s32.totalorder %s3654_s11, %s3335_s5  ;;  %s3340_s0 = sshll.u32 %s3434_s13, 4  ;;  %s3341_s0 = int_to_ptr.vmem [resolvable:$false] %s3340_s0 }
  0x7f   : > { %s3342_s24 = scalar_lea.vmem %s3341_s0, 16384  ;;  %p3343_p1 = scmp.lt.s32.totalorder %s3654_s11, %s3341_s0 }
  0x80   : > { %p3338_p3 = pnand %p3336_p4, %p3547_p2  ;;  %p3344_p7 = scmp.lt.s32.totalorder %s3342_s24, %s3335_s5 }
  0x82   : > { %p3339_p5 = pneg %p3338_p3  ;;  %p3345_p6 = por %p3344_p7, %p3343_p1 }
  0x84   : > { %p3346_p12 = pnand %p3345_p6, %p3339_p5 }
  0x86   : > { %3349 = shalt.err (!%p3346_p12)
}
  0x87   : > { %2954 = dma.hbm_to_vmem [thread:$0]  (!%p3520_p13), %s3651_s22, 8192, %s3654_s11, %s238_s20, %s3431_s10, %s3431_s10, %s3432_s8  }
  0x88   : > { %p4333_p2 = scmp.ne.s32.totalorder %s4331_s30, 0 }
  0x89   : > { %s3686_s14 = sand.u32 (!%p4333_p2), 1, %s3416_s16   ;;  %p4334_p9 = scmp.ne.s32.totalorder (!%p4333_p2), %s4324_s25, 0 }
  0x8a   : > { %260 = sbr.rel (%p4333_p2) target bundleno = 2386 (0x952), region = 36  ;;  %s2269_s9 = sshll.u32 (!%p4333_p2), %s3686_s14, 5 }
  0x8b   : > { %s263_s17 = scalar_lea.sflag (!%p4333_p2), [#allocation3], %s3686_s14  ;;  %s3690_s29 = scalar_lea.vmem (!%p4333_p2), [#allocation2], %s2269_s9 }
  0x91   : > { %3395 = dma.done.wait (%p4334_p9), %s263_s17, 512  }
  0x92   : > { %3397 = vsyncadd (%p4334_p9), %s263_s17, 4294966784  ;;  %s271_s28 = sand.u32 1, %s3484_s19   ;;  %s2270_s30 = sshll.u32 %s3686_s14, 9 }
  0x93   : > { %s272_s10 = scalar_lea.sflag [#allocation6], %s271_s28  ;;  %s3698_s8 = scalar_lea.vmem [#allocation5], %s2270_s30 }
  0x94   : > { %3399 = dma.done.wait (%p4334_p9), %s272_s10, 16384  }
  0x95   : > { %3401 = vsyncadd (%p4334_p9), %s272_s10, 4294950912  ;;  %s3704_s22 = scalar_lea.vmem [#allocation7], %s2270_s30  ;;  %s290_s11 = scalar_lea.sflag [#allocation9], %s3686_s14 }
  0x96   : > { %s3707_s20 = scalar_lea.vmem [#allocation8], %s2270_s30 }
  0x97   : > { %3403 = dma.done.wait (%p4334_p9), %s290_s11, 8192  }
  0x98   : > { %3405 = vsyncadd (%p4334_p9), %s290_s11, 4294959104  ;;  %v3000_v0 = vld [vmem:[%s3698_s8 + $0x4] ss:$8 sps:$4 sm:$0xff]   ;;  %v3435_v1 = vmov 0.0   ;;  %v3002_v2 = vld [vmem:[%s3698_s8] ss:$8 sps:$4 sm:$0xff]  }
  0x99   : > { %957 = vmatprep.mubr.f32.mxu1 %v3435_v1  ;;  %743 = vmatprep.subr.bf16.mxu0 %v3000_v0  ;;  %v3003_v3 = vld [vmem:[%s3698_s8 + $0x14] ss:$8 sps:$4 sm:$0xff]   ;;  %v3005_v4 = vld [vmem:[%s3698_s8 + $0x10] ss:$8 sps:$4 sm:$0xff]   ;;  %v3006_v5 = vld [vmem:[%s3698_s8 + $0x24] ss:$8 sps:$4 sm:$0xff]  }
  0x9a   : > { %744 = vmatpush1.bf16.msra.mxu0 %v3002_v2  ;;  %v3008_v6 = vld [vmem:[%s3698_s8 + $0x20] ss:$8 sps:$4 sm:$0xff]   ;;  %v3009_v7 = vld [vmem:[%s3698_s8 + $0x34] ss:$8 sps:$4 sm:$0xff]   ;;  %v3011_v8 = vld [vmem:[%s3698_s8 + $0x30] ss:$8 sps:$4 sm:$0xff]  }
  0x9b   : > { %745 = vmatprep.subr.bf16.mxu0 %v3003_v3  ;;  %v3012_v9 = vld [vmem:[%s3698_s8 + $0x44] ss:$8 sps:$4 sm:$0xff]   ;;  %v3014_v10 = vld [vmem:[%s3698_s8 + $0x40] ss:$8 sps:$4 sm:$0xff]   ;;  %v3015_v11 = vld [vmem:[%s3698_s8 + $0x54] ss:$8 sps:$4 sm:$0xff]  }
  0x9c   : > { %v3017_v12 = vld [vmem:[%s3698_s8 + $0x50] ss:$8 sps:$4 sm:$0xff]   ;;  %v3018_v13 = vld [vmem:[%s3698_s8 + $0x64] ss:$8 sps:$4 sm:$0xff]   ;;  %v3020_v16 = vld [vmem:[%s3698_s8 + $0x60] ss:$8 sps:$4 sm:$0xff]  }
  0x9d   : > { %v830_v14 = vld [vmem:[%s3704_s22 + $0x8] sm:$0xff]  ;;  %v832_v15 = vld [vmem:[%s3704_s22 + $0x18] sm:$0xff]  ;;  %v3050_v18 = vld [vmem:[%s3690_s29 + $0x4] ss:$16 sps:$4 sm:$0xff]   ;;  %s2273_s25 = sshll.u32 %s3686_s14, 3  ;;  %s2415_s12 = sshll.u32 %s3484_s19, 7 }
  0x9e   : > { %746 = vmatpush1.bf16.msra.mxu0 %v3005_v4  ;;  %v3730_v17 = vpack.c.bf16 %v832_v15, %v830_v14  ;;  %v3021_v19 = vld [vmem:[%s3698_s8 + $0x74] ss:$8 sps:$4 sm:$0xff]   ;;  %v829_v20 = vld [vmem:[%s3704_s22] sm:$0xff]  ;;  %775 = vmatprep.mubr.bf16.mxu0 %v3050_v18  ;;  %v834_v22 = vld [vmem:[%s3704_s22 + $0x28] sm:$0xff]  ;;  %s332_s7 = scalar_lea.vmem [#allocation10], %s2273_s25  ;;  %s4268_s5 = scalar_lea.hbm %s4316_s4, %s2415_s12 }
  0x9f   : > { %747 = vmatprep.subr.bf16.mxu0 %v3006_v5  ;;  %v831_v21 = vld [vmem:[%s3704_s22 + $0x10] sm:$0xff]  ;;  %v836_v23 = vld [vmem:[%s3704_s22 + $0x38] sm:$0xff]  ;;  %v3024_v27 = vld [vmem:[%s3698_s8 + $0x84] ss:$8 sps:$4 sm:$0xff]   ;;  %s2117_s23 = sshll.u32 %s332_s7, 4  ;;  %s2103_s13 = scalar_lea.sflag [#allocation4], %s3686_s14  ;;  %s4270_s23 = int_to_ptr.vmem [resolvable:$true] %s2117_s23 }
  0xa0   : > { %2417 = vmatprep.subr.bf16.mxu1 %v3730_v17  ;;  %v3023_v24 = vld [vmem:[%s3698_s8 + $0x70] ss:$8 sps:$4 sm:$0xff]   ;;  %v3740_v25 = vpack.c.bf16 %v831_v21, %v829_v20  ;;  %v3742_v26 = vpack.c.bf16 %v836_v23, %v834_v22  ;;  %v833_v28 = vld [vmem:[%s3704_s22 + $0x20] sm:$0xff]  ;;  %v838_v31 = vld [vmem:[%s3704_s22 + $0x48] sm:$0xff]  ;;  %s3350_s0 = scalar_lea.vmem %s4270_s23, 128  ;;  %p4335_p0 = scmp.ne.s32.totalorder %s4325_s26, 0 }
  0xa1   : > { %v835_v29 = vld [vmem:[%s3704_s22 + $0x30] sm:$0xff]  ;;  %v840_v32 = vld [vmem:[%s3704_s22 + $0x58] sm:$0xff]  ;;  %v3026_v33 = vld [vmem:[%s3698_s8 + $0x80] ss:$8 sps:$4 sm:$0xff]   ;;  %p3351_p13 = scmp.ne.s32.totalorder %s4270_s23, %s3350_s0  ;;  %s3437_s19 = smov [#allocation10]  }
  0xa2   : > { %748 = vmatpush1.bf16.msra.mxu0 %v3008_v6  ;;  %2419 = vmatpush1.bf16.msra.mxu1 %v3740_v25  ;;  %v3748_v30 = vpack.c.bf16 %v835_v29, %v833_v28  ;;  %v3754_v34 = vpack.c.bf16 %v840_v32, %v838_v31  ;;  %v837_v35 = vld [vmem:[%s3704_s22 + $0x40] sm:$0xff]  ;;  %v839_v36 = vld [vmem:[%s3704_s22 + $0x50] sm:$0xff]  ;;  %v842_v37 = vld [vmem:[%s3704_s22 + $0x68] sm:$0xff]  ;;  %s3354_s24 = sshll.u32 %s3437_s19, 4  ;;  %s3355_s24 = int_to_ptr.vmem [resolvable:$false] %s3354_s24 }
  0xa3   : > { %749 = vmatprep.subr.bf16.mxu0 %v3009_v7  ;;  %2421 = vmatprep.subr.bf16.mxu1 %v3742_v26  ;;  %v844_v38 = vld [vmem:[%s3704_s22 + $0x78] sm:$0xff]  ;;  %v3762_v40 = vpack.c.bf16 %v839_v36, %v837_v35  ;;  %v841_v42 = vld [vmem:[%s3704_s22 + $0x60] sm:$0xff]  ;;  %v843_v43 = vld [vmem:[%s3704_s22 + $0x70] sm:$0xff]  ;;  %p3352_p8 = pnand %p3351_p13, %p4335_p0  ;;  %s3356_s9 = scalar_lea.vmem %s3355_s24, 256 }
  0xa4   : > { %v3027_v39 = vld [vmem:[%s3698_s8 + $0x94] ss:$8 sps:$4 sm:$0xff]   ;;  %v3765_v41 = vpack.c.bf16 %v844_v38, %v842_v37  ;;  %v846_v44 = vld [vmem:[%s3704_s22 + $0x88] sm:$0xff]  ;;  %v3029_v46 = vld [vmem:[%s3698_s8 + $0x90] ss:$8 sps:$4 sm:$0xff]   ;;  %v3774_v48 = vpack.c.bf16 %v843_v43, %v841_v42  ;;  %p3357_p11 = scmp.lt.s32.totalorder %s4270_s23, %s3355_s24  ;;  %p3358_p4 = scmp.lt.s32.totalorder %s3356_s9, %s3350_s0 }
  0xa5   : > { %v848_v45 = vld [vmem:[%s3704_s22 + $0x98] sm:$0xff]  ;;  %v3030_v47 = vld [vmem:[%s3698_s8 + $0xa4] ss:$8 sps:$4 sm:$0xff]   ;;  %v847_v51 = vld [vmem:[%s3704_s22 + $0x90] sm:$0xff]  ;;  %p3353_p10 = pneg %p3352_p8 }
  0xa6   : > { %750 = vmatpush1.bf16.msra.mxu0 %v3011_v8  ;;  %2423 = vmatpush1.bf16.msra.mxu1 %v3748_v30  ;;  %v3777_v49 = vpack.c.bf16 %v848_v45, %v846_v44  ;;  %v845_v50 = vld [vmem:[%s3704_s22 + $0x80] sm:$0xff]  ;;  %v850_v52 = vld [vmem:[%s3704_s22 + $0xa8] sm:$0xff]  ;;  %v852_v53 = vld [vmem:[%s3704_s22 + $0xb8] sm:$0xff]  ;;  %p3359_p3 = por %p3358_p4, %p3357_p11 }
  0xa7   : > { %751 = vmatprep.subr.bf16.mxu0 %v3012_v9  ;;  %2425 = vmatprep.subr.bf16.mxu1 %v3754_v34  ;;  %v3032_v54 = vld [vmem:[%s3698_s8 + $0xa0] ss:$8 sps:$4 sm:$0xff]   ;;  %v3033_v55 = vld [vmem:[%s3698_s8 + $0xb4] ss:$8 sps:$4 sm:$0xff]   ;;  %v3786_v56 = vpack.c.bf16 %v847_v51, %v845_v50  ;;  %v3789_v57 = vpack.c.bf16 %v852_v53, %v850_v52  ;;  %v3035_v62 = vld [vmem:[%s3698_s8 + $0xb0] ss:$8 sps:$4 sm:$0xff]  }
  0xa8   : > { %v849_v58 = vld [vmem:[%s3704_s22 + $0xa0] sm:$0xff]  ;;  %v851_v59 = vld [vmem:[%s3704_s22 + $0xb0] sm:$0xff]  ;;  %v854_v60 = vld [vmem:[%s3704_s22 + $0xc8] sm:$0xff]  ;;  %p3360_p5 = pnand %p3359_p3, %p3353_p10 }
  0xa9   : > { %v856_v61 = vld [vmem:[%s3704_s22 + $0xd8] sm:$0xff]  ;;  %v3036_v63 = vld [vmem:[%s3698_s8 + $0xc4] ss:$8 sps:$4 sm:$0xff]   ;;  %v3798_v0 = vpack.c.bf16 %v851_v59, %v849_v58  ;;  %v855_v4 = vld [vmem:[%s3704_s22 + $0xd0] sm:$0xff] }
  0xaa   : > { %752 = vmatpush1.bf16.msra.mxu0 %v3014_v10  ;;  %2427 = vmatpush1.bf16.msra.mxu1 %v3762_v40  ;;  %v3801_v2 = vpack.c.bf16 %v856_v61, %v854_v60  ;;  %v853_v3 = vld [vmem:[%s3704_s22 + $0xc0] sm:$0xff]  ;;  %v858_v5 = vld [vmem:[%s3704_s22 + $0xe8] sm:$0xff]  ;;  %v860_v6 = vld [vmem:[%s3704_s22 + $0xf8] sm:$0xff] }
  0xab   : > { %753 = vmatprep.subr.bf16.mxu0 %v3015_v11  ;;  %2429 = vmatprep.subr.bf16.mxu1 %v3765_v41  ;;  %v3038_v7 = vld [vmem:[%s3698_s8 + $0xc0] ss:$8 sps:$4 sm:$0xff]   ;;  %v3039_v8 = vld [vmem:[%s3698_s8 + $0xd4] ss:$8 sps:$4 sm:$0xff]   ;;  %v3810_v9 = vpack.c.bf16 %v855_v4, %v853_v3  ;;  %v3813_v10 = vpack.c.bf16 %v860_v6, %v858_v5  ;;  %v3041_v15 = vld [vmem:[%s3698_s8 + $0xd0] ss:$8 sps:$4 sm:$0xff]  }
  0xac   : > { %v857_v11 = vld [vmem:[%s3704_s22 + $0xe0] sm:$0xff]  ;;  %v864_v14 = vld [vmem:[%s3704_s22 + $0x118] sm:$0xff]  ;;  %v863_v21 = vld [vmem:[%s3704_s22 + $0x110] sm:$0xff] }
  0xad   : > { %v861_v20 = vld [vmem:[%s3704_s22 + $0x100] sm:$0xff]  ;;  %v866_v22 = vld [vmem:[%s3704_s22 + $0x128] sm:$0xff]  ;;  %v868_v23 = vld [vmem:[%s3704_s22 + $0x138] sm:$0xff] }
  0xae   : > { %754 = vmatpush1.bf16.msra.mxu0 %v3017_v12  ;;  %2431 = vmatpush1.bf16.msra.mxu1 %v3774_v48  ;;  %v859_v12 = vld [vmem:[%s3704_s22 + $0xf0] sm:$0xff]  ;;  %v3834_v28 = vpack.c.bf16 %v863_v21, %v861_v20  ;;  %v3837_v29 = vpack.c.bf16 %v868_v23, %v866_v22  ;;  %v865_v31 = vld [vmem:[%s3704_s22 + $0x120] sm:$0xff]  ;;  %v872_v35 = vld [vmem:[%s3704_s22 + $0x158] sm:$0xff] }
  0xaf   : > { %755 = vmatprep.subr.bf16.mxu0 %v3018_v13  ;;  %2433 = vmatprep.subr.bf16.mxu1 %v3777_v49  ;;  %v862_v13 = vld [vmem:[%s3704_s22 + $0x108] sm:$0xff]  ;;  %v3822_v18 = vpack.c.bf16 %v859_v12, %v857_v11  ;;  %v867_v32 = vld [vmem:[%s3704_s22 + $0x130] sm:$0xff]  ;;  %v869_v42 = vld [vmem:[%s3704_s22 + $0x140] sm:$0xff] }
  0xb0   : > { %v3047_v36 = vld [vmem:[%s3698_s8 + $0xf0] ss:$8 sps:$4 sm:$0xff]   ;;  %v3053_v37 = vld [vmem:[%s3698_s8 + $0x104] ss:$8 sps:$4 sm:$0xff]   ;;  %v3846_v38 = vpack.c.bf16 %v867_v32, %v865_v31  ;;  %v3056_v50 = vld [vmem:[%s3698_s8 + $0x114] ss:$8 sps:$4 sm:$0xff]  }
  0xb1   : > { %v871_v43 = vld [vmem:[%s3704_s22 + $0x150] sm:$0xff]  ;;  %v874_v45 = vld [vmem:[%s3704_s22 + $0x168] sm:$0xff]  ;;  %v873_v52 = vld [vmem:[%s3704_s22 + $0x160] sm:$0xff] }
  0xb2   : > { %756 = vmatpush1.bf16.msra.mxu0 %v3020_v16  ;;  %2435 = vmatpush1.bf16.msra.mxu1 %v3786_v56  ;;  %v3042_v16 = vld [vmem:[%s3698_s8 + $0xe4] ss:$8 sps:$4 sm:$0xff]   ;;  %v3048_v44 = vld [vmem:[%s3690_s29] ss:$16 sps:$4 sm:$0xff]   ;;  %v3859_v51 = vpack.c.bf16 %v871_v43, %v869_v42  ;;  %v880_v60 = vld [vmem:[%s3704_s22 + $0x198] sm:$0xff] }
  0xb3   : > { %757 = vmatprep.subr.bf16.mxu0 %v3021_v19  ;;  %2437 = vmatprep.subr.bf16.mxu1 %v3789_v57  ;;  %v3825_v19 = vpack.c.bf16 %v864_v14, %v862_v13  ;;  %v875_v53 = vld [vmem:[%s3704_s22 + $0x170] sm:$0xff]  ;;  %v878_v58 = vld [vmem:[%s3704_s22 + $0x188] sm:$0xff]  ;;  %v884_v5 = vld [vmem:[%s3704_s22 + $0x1b8] sm:$0xff] }
  0xb4   : > { %v3059_v59 = vld [vmem:[%s3698_s8 + $0x124] ss:$8 sps:$4 sm:$0xff]   ;;  %v3874_v3 = vpack.c.bf16 %v875_v53, %v873_v52  ;;  %v3057_v6 = vld [vmem:[%s3698_s8 + $0x120] ss:$8 sps:$4 sm:$0xff]   ;;  %v883_v12 = vld [vmem:[%s3704_s22 + $0x1b0] sm:$0xff] }
  0xb5   : > { %v3101_v61 = vld [vmem:[%s3690_s29 + $0xc] ss:$16 sps:$4 sm:$0xff]   ;;  %v881_v11 = vld [vmem:[%s3704_s22 + $0x1a0] sm:$0xff]  ;;  %v887_v23 = vld [vmem:[%s3704_s22 + $0x1d0] sm:$0xff] }
  0xb6   : > { %758 = vmatpush1.bf16.msra.mxu0 %v3023_v24  ;;  %2439 = vmatpush1.bf16.msra.mxu1 %v3798_v0  ;;  %v3044_v24 = vld [vmem:[%s3698_s8 + $0xe0] ss:$8 sps:$4 sm:$0xff]   ;;  %v3065_v21 = vld [vmem:[%s3698_s8 + $0x144] ss:$8 sps:$4 sm:$0xff]   ;;  %v892_v31 = vld [vmem:[%s3704_s22 + $0x1f8] sm:$0xff] }
  0xb7   : > { %759 = vmatprep.subr.bf16.mxu0 %v3024_v27  ;;  %2441 = vmatprep.subr.bf16.mxu1 %v3801_v2  ;;  %v3045_v27 = vld [vmem:[%s3698_s8 + $0xf4] ss:$8 sps:$4 sm:$0xff]   ;;  %v882_v4 = vld [vmem:[%s3704_s22 + $0x1a8] sm:$0xff]  ;;  %v885_v22 = vld [vmem:[%s3704_s22 + $0x1c0] sm:$0xff] }
  0xb8   : > { %v886_v14 = vld [vmem:[%s3704_s22 + $0x1c8] sm:$0xff]  ;;  %v3892_v20 = vpack.c.bf16 %v884_v5, %v882_v4  ;;  %v3910_v42 = vpack.c.bf16 %v887_v23, %v885_v22  ;;  %v3066_v43 = vld [vmem:[%s3698_s8 + $0x150] ss:$8 sps:$4 sm:$0xff]   ;;  %v3092_v5 = vld [vmem:[%s3698_s8 + $0x1d4] ss:$8 sps:$4 sm:$0xff]  }
  0xb9   : > { %v3063_v32 = vld [vmem:[%s3698_s8 + $0x140] ss:$8 sps:$4 sm:$0xff]   ;;  %v3072_v52 = vld [vmem:[%s3698_s8 + $0x170] ss:$8 sps:$4 sm:$0xff]   ;;  %v3077_v53 = vld [vmem:[%s3698_s8 + $0x184] ss:$8 sps:$4 sm:$0xff]  }
  0xba   : > { %760 = vmatpush1.bf16.msra.mxu0 %v3026_v33  ;;  %2443 = vmatpush1.bf16.msra.mxu1 %v3810_v9  ;;  %v870_v33 = vld [vmem:[%s3704_s22 + $0x148] sm:$0xff] }
  0xbb   : > { %761 = vmatprep.subr.bf16.mxu0 %v3027_v39  ;;  %2445 = vmatprep.subr.bf16.mxu1 %v3813_v10  ;;  %v3849_v39 = vpack.c.bf16 %v872_v35, %v870_v33  ;;  %v3068_v35 = vld [vmem:[%s3698_s8 + $0x154] ss:$8 sps:$4 sm:$0xff]   ;;  %v3087_v4 = vld [vmem:[%s3698_s8 + $0x1c0] ss:$8 sps:$4 sm:$0xff]  }
  0xbe   : > { %762 = vmatpush1.bf16.msra.mxu0 %v3029_v46  ;;  %2447 = vmatpush1.bf16.msra.mxu1 %v3822_v18  ;;  %v876_v46 = vld [vmem:[%s3704_s22 + $0x178] sm:$0xff] }
  0xbf   : > { %763 = vmatprep.subr.bf16.mxu0 %v3030_v47  ;;  %2449 = vmatprep.subr.bf16.mxu1 %v3825_v19  ;;  %v3051_v47 = vld [vmem:[%s3698_s8 + $0x100] ss:$8 sps:$4 sm:$0xff]  }
  0xc2   : > { %764 = vmatpush1.bf16.msra.mxu0 %v3032_v54  ;;  %2451 = vmatpush1.bf16.msra.mxu1 %v3834_v28  ;;  %v3054_v54 = vld [vmem:[%s3698_s8 + $0x110] ss:$8 sps:$4 sm:$0xff]  }
  0xc3   : > { %765 = vmatprep.subr.bf16.mxu0 %v3033_v55  ;;  %2453 = vmatprep.subr.bf16.mxu1 %v3837_v29  ;;  %v3865_v55 = vpack.c.bf16 %v876_v46, %v874_v45  ;;  %v3071_v45 = vld [vmem:[%s3698_s8 + $0x164] ss:$8 sps:$4 sm:$0xff]  }
  0xc6   : > { %766 = vmatpush1.bf16.msra.mxu0 %v3035_v62  ;;  %2455 = vmatpush1.bf16.msra.mxu1 %v3846_v38  ;;  %v877_v62 = vld [vmem:[%s3704_s22 + $0x180] sm:$0xff] }
  0xc7   : > { %767 = vmatprep.subr.bf16.mxu0 %v3036_v63  ;;  %2457 = vmatprep.subr.bf16.mxu1 %v3849_v39  ;;  %v879_v63 = vld [vmem:[%s3704_s22 + $0x190] sm:$0xff] }
  0xc8   : > { %v3886_v13 = vpack.c.bf16 %v879_v63, %v877_v62  ;;  %v3084_v62 = vld [vmem:[%s3698_s8 + $0x1b0] ss:$8 sps:$4 sm:$0xff]   ;;  %v3089_v63 = vld [vmem:[%s3698_s8 + $0x1c4] ss:$8 sps:$4 sm:$0xff]  }
  0xca   : > { %768 = vmatpush1.bf16.msra.mxu0 %v3038_v7  ;;  %2459 = vmatpush1.bf16.msra.mxu1 %v3859_v51  ;;  %v3880_v7 = vpack.c.bf16 %v880_v60, %v878_v58  ;;  %v3080_v58 = vld [vmem:[%s3698_s8 + $0x194] ss:$8 sps:$4 sm:$0xff]   ;;  %v3081_v60 = vld [vmem:[%s3698_s8 + $0x1a0] ss:$8 sps:$4 sm:$0xff]  }
  0xcb   : > { %769 = vmatprep.subr.bf16.mxu0 %v3039_v8  ;;  %2461 = vmatprep.subr.bf16.mxu1 %v3865_v55  ;;  %v3062_v8 = vld [vmem:[%s3698_s8 + $0x134] ss:$8 sps:$4 sm:$0xff]  }
  0xce   : > { %770 = vmatpush1.bf16.msra.mxu0 %v3041_v15  ;;  %2463 = vmatpush1.bf16.msra.mxu1 %v3874_v3  ;;  %v888_v15 = vld [vmem:[%s3704_s22 + $0x1d8] sm:$0xff] }
  0xcf   : > { %771 = vmatprep.subr.bf16.mxu0 %v3042_v16  ;;  %v3060_v16 = vld [vmem:[%s3698_s8 + $0x130] ss:$8 sps:$4 sm:$0xff]   ;;  %2465 = vmatprep.subr.bf16.mxu1 %v3880_v7  ;;  %v3904_v33 = vpack.c.bf16 %v888_v15, %v886_v14 }
  0xd0   : > { %v3096_v14 = vld [vmem:[%s3698_s8 + $0x1f0] ss:$8 sps:$4 sm:$0xff]  }
  0xd1   : > { %v3099_v15 = vld [vmem:[%s3690_s29 + $0x8] ss:$16 sps:$4 sm:$0xff]  }
  0xd2   : > { %772 = vmatpush1.bf16.msra.mxu0 %v3044_v24  ;;  %2467 = vmatpush1.bf16.msra.mxu1 %v3886_v13  ;;  %v3898_v24 = vpack.c.bf16 %v883_v12, %v881_v11  ;;  %v3093_v11 = vld [vmem:[%s3698_s8 + $0x1e0] ss:$8 sps:$4 sm:$0xff]   ;;  %v3098_v12 = vld [vmem:[%s3698_s8 + $0x1f4] ss:$8 sps:$4 sm:$0xff]  }
  0xd3   : > { %773 = vmatprep.subr.bf16.mxu0 %v3045_v27  ;;  %v890_v27 = vld [vmem:[%s3704_s22 + $0x1e8] sm:$0xff]  ;;  %2469 = vmatprep.subr.bf16.mxu1 %v3892_v20 }
  0xd6   : > { %774 = vmatpush1.bf16.msra.mxu0 %v3047_v36  ;;  %v889_v36 = vld [vmem:[%s3704_s22 + $0x1e0] sm:$0xff]  ;;  %2471 = vmatpush1.bf16.msra.mxu1 %v3898_v24 }
  0xd7   : > { %786 = vmatprep.subr.bf16.mxu0 %v3053_v37  ;;  %v891_v37 = vld [vmem:[%s3704_s22 + $0x1f0] sm:$0xff]  ;;  %2473 = vmatprep.subr.bf16.mxu1 %v3904_v33 }
  0xd8   : > { %v3918_v46 = vpack.c.bf16 %v891_v37, %v889_v36 }
  0xd9   : > { %776 = vmatmul.mubr.bf16.vlgmr.msra.gmra.mrb[0].mxu0 %v3048_v44  ;;  %v3914_v44 = vpack.c.bf16 %v892_v31, %v890_v27 }
  0xda   : > { %787 = vmatpush1.bf16.msra.mxu0 %v3051_v47  ;;  %818 = vmatprep.mubr.bf16.mxu0 %v3101_v61  ;;  %v3069_v47 = vld [vmem:[%s3698_s8 + $0x160] ss:$8 sps:$4 sm:$0xff]   ;;  %v3086_v61 = vld [vmem:[%s3698_s8 + $0x1b4] ss:$8 sps:$4 sm:$0xff]  }
  0xdb   : > { %788 = vmatprep.subr.bf16.mxu0 %v3056_v50  ;;  %2475 = vmatpush1.bf16.msra.mxu1 %v3910_v42  ;;  %v3074_v50 = vld [vmem:[%s3698_s8 + $0x174] ss:$8 sps:$4 sm:$0xff]  }
  0xdc   : > { %2477 = vmatprep.subr.bf16.mxu1 %v3914_v44 }
  0xde   : > { %789 = vmatpush1.bf16.msra.mxu0 %v3054_v54  ;;  %v3075_v54 = vld [vmem:[%s3698_s8 + $0x180] ss:$8 sps:$4 sm:$0xff]  }
  0xdf   : > { %790 = vmatprep.subr.bf16.mxu0 %v3059_v59  ;;  %2479 = vmatpush1.bf16.msra.mxu1 %v3918_v46  ;;  %v3083_v59 = vld [vmem:[%s3698_s8 + $0x1a4] ss:$8 sps:$4 sm:$0xff]  }
  0xe0   : > { %2481 = vmatprep.subr.bf16.mxu1 %v3730_v17 }
  0xe2   : > { %791 = vmatpush1.bf16.msra.mxu0 %v3057_v6  ;;  %958 = vmatmul.mubr.f32.vlgmr.msra.gmra.mrb[0].mxu1 %v3435_v1  ;;  %v3078_v1 = vld [vmem:[%s3698_s8 + $0x190] ss:$8 sps:$4 sm:$0xff]  }
  0xe3   : > { %792 = vmatprep.subr.bf16.mxu0 %v3062_v8  ;;  %2483 = vmatpush1.bf16.msra.mxu1 %v3740_v25  ;;  %v3090_v6 = vld [vmem:[%s3698_s8 + $0x1d0] ss:$8 sps:$4 sm:$0xff]   ;;  %v3095_v8 = vld [vmem:[%s3698_s8 + $0x1e4] ss:$8 sps:$4 sm:$0xff]  }
  0xe4   : > { %2485 = vmatprep.subr.bf16.mxu1 %v3742_v26 }
  0xe6   : > { %793 = vmatpush1.bf16.msra.mxu0 %v3060_v16 }
  0xe7   : > { %794 = vmatprep.subr.bf16.mxu0 %v3065_v21  ;;  %2487 = vmatpush1.bf16.msra.mxu1 %v3748_v30 }
  0xe8   : > { %2489 = vmatprep.subr.bf16.mxu1 %v3754_v34 }
  0xea   : > { %795 = vmatpush1.bf16.msra.mxu0 %v3063_v32 }
  0xeb   : > { %796 = vmatprep.subr.bf16.mxu0 %v3068_v35  ;;  %2491 = vmatpush1.bf16.msra.mxu1 %v3762_v40 }
  0xec   : > { %2493 = vmatprep.subr.bf16.mxu1 %v3765_v41 }
  0xee   : > { %797 = vmatpush1.bf16.msra.mxu0 %v3066_v43 }
  0xef   : > { %798 = vmatprep.subr.bf16.mxu0 %v3071_v45  ;;  %2495 = vmatpush1.bf16.msra.mxu1 %v3774_v48 }
  0xf0   : > { %2497 = vmatprep.subr.bf16.mxu1 %v3777_v49 }
  0xf2   : > { %799 = vmatpush1.bf16.msra.mxu0 %v3069_v47 }
  0xf3   : > { %800 = vmatprep.subr.bf16.mxu0 %v3074_v50  ;;  %2499 = vmatpush1.bf16.msra.mxu1 %v3786_v56 }
  0xf4   : > { %2501 = vmatprep.subr.bf16.mxu1 %v3789_v57 }
  0xf6   : > { %801 = vmatpush1.bf16.msra.mxu0 %v3072_v52 }
  0xf7   : > { %802 = vmatprep.subr.bf16.mxu0 %v3077_v53  ;;  %2503 = vmatpush1.bf16.msra.mxu1 %v3798_v0 }
  0xf8   : > { %2505 = vmatprep.subr.bf16.mxu1 %v3801_v2 }
  0xfa   : > { %803 = vmatpush1.bf16.msra.mxu0 %v3075_v54 }
  0xfb   : > { %804 = vmatprep.subr.bf16.mxu0 %v3080_v58  ;;  %2507 = vmatpush1.bf16.msra.mxu1 %v3810_v9 }
  0xfc   : > { %2509 = vmatprep.subr.bf16.mxu1 %v3813_v10 }
  0xfe   : > { %805 = vmatpush1.bf16.msra.mxu0 %v3078_v1 }
  0xff   : > { %806 = vmatprep.subr.bf16.mxu0 %v3083_v59  ;;  %2511 = vmatpush1.bf16.msra.mxu1 %v3822_v18 }
 0x100   : > { %2513 = vmatprep.subr.bf16.mxu1 %v3825_v19 }
 0x102   : > { %807 = vmatpush1.bf16.msra.mxu0 %v3081_v60 }
 0x103   : > { %808 = vmatprep.subr.bf16.mxu0 %v3086_v61  ;;  %2515 = vmatpush1.bf16.msra.mxu1 %v3834_v28 }
 0x104   : > { %2517 = vmatprep.subr.bf16.mxu1 %v3837_v29 }
 0x106   : > { %809 = vmatpush1.bf16.msra.mxu0 %v3084_v62 }
 0x107   : > { %810 = vmatprep.subr.bf16.mxu0 %v3089_v63  ;;  %2519 = vmatpush1.bf16.msra.mxu1 %v3846_v38 }
 0x108   : > { %2521 = vmatprep.subr.bf16.mxu1 %v3849_v39 }
 0x10a   : > { %811 = vmatpush1.bf16.msra.mxu0 %v3087_v4 }
 0x10b   : > { %812 = vmatprep.subr.bf16.mxu0 %v3092_v5  ;;  %2523 = vmatpush1.bf16.msra.mxu1 %v3859_v51 }
 0x10c   : > { %2525 = vmatprep.subr.bf16.mxu1 %v3865_v55 }
 0x10e   : > { %813 = vmatpush1.bf16.msra.mxu0 %v3090_v6 }
 0x10f   : > { %814 = vmatprep.subr.bf16.mxu0 %v3095_v8  ;;  %2527 = vmatpush1.bf16.msra.mxu1 %v3874_v3 }
 0x110   : > { %2529 = vmatprep.subr.bf16.mxu1 %v3880_v7 }
 0x112   : > { %815 = vmatpush1.bf16.msra.mxu0 %v3093_v11 }
 0x113   : > { %816 = vmatprep.subr.bf16.mxu0 %v3098_v12  ;;  %2531 = vmatpush1.bf16.msra.mxu1 %v3886_v13 }
 0x114   : > { %2533 = vmatprep.subr.bf16.mxu1 %v3892_v20 }
 0x116   : > { %817 = vmatpush1.bf16.msra.mxu0 %v3096_v14 }
 0x117   : > { %2545 = vmatprep.subr.bf16.mxu0 %v3730_v17  ;;  %2535 = vmatpush1.bf16.msra.mxu1 %v3898_v24 }
 0x118   : > { %2537 = vmatprep.subr.bf16.mxu1 %v3904_v33 }
 0x119   : > { %819 = vmatmul.mubr.bf16.vlgmr.msra.gmra.mrb[0].mxu0 %v3099_v15 }
 0x11a   : > { %2547 = vmatpush1.bf16.msra.mxu0 %v3740_v25 }
 0x11b   : > { %2549 = vmatprep.subr.bf16.mxu0 %v3742_v26  ;;  %2539 = vmatpush1.bf16.msra.mxu1 %v3910_v42 }
 0x11c   : > { %2541 = vmatprep.subr.bf16.mxu1 %v3914_v44 }
 0x11e   : > { %2551 = vmatpush1.bf16.msra.mxu0 %v3748_v30 }
 0x11f   : > { %2553 = vmatprep.subr.bf16.mxu0 %v3754_v34  ;;  %2543 = vmatpush1.bf16.msra.mxu1 %v3918_v46 }
 0x120   : > { %2609 = vmatprep.subr.bf16.mxu1 %v3730_v17 }
 0x122   : > { %2555 = vmatpush1.bf16.msra.mxu0 %v3762_v40 }
 0x123   : > { %2557 = vmatprep.subr.bf16.mxu0 %v3765_v41 }
 0x126   : > { %2559 = vmatpush1.bf16.msra.mxu0 %v3774_v48 }
 0x127   : > { %2561 = vmatprep.subr.bf16.mxu0 %v3777_v49 }
 0x12a   : > { %2563 = vmatpush1.bf16.msra.mxu0 %v3786_v56 }
 0x12b   : > { %2565 = vmatprep.subr.bf16.mxu0 %v3789_v57 }
 0x12e   : > { %2567 = vmatpush1.bf16.msra.mxu0 %v3798_v0 }
 0x12f   : > { %2569 = vmatprep.subr.bf16.mxu0 %v3801_v2 }
 0x132   : > { %2571 = vmatpush1.bf16.msra.mxu0 %v3810_v9 }
 0x133   : > { %2573 = vmatprep.subr.bf16.mxu0 %v3813_v10 }
 0x136   : > { %2575 = vmatpush1.bf16.msra.mxu0 %v3822_v18 }
 0x137   : > { %2577 = vmatprep.subr.bf16.mxu0 %v3825_v19 }
 0x13a   : > { %2579 = vmatpush1.bf16.msra.mxu0 %v3834_v28 }
 0x13b   : > { %2581 = vmatprep.subr.bf16.mxu0 %v3837_v29 }
 0x13e   : > { %2583 = vmatpush1.bf16.msra.mxu0 %v3846_v38 }
 0x13f   : > { %2585 = vmatprep.subr.bf16.mxu0 %v3849_v39 }
 0x142   : > { %2587 = vmatpush1.bf16.msra.mxu0 %v3859_v51 }
 0x143   : > { %2589 = vmatprep.subr.bf16.mxu0 %v3865_v55 }
 0x146   : > { %2591 = vmatpush1.bf16.msra.mxu0 %v3874_v3 }
 0x147   : > { %2593 = vmatprep.subr.bf16.mxu0 %v3880_v7 }
 0x14a   : > { %2595 = vmatpush1.bf16.msra.mxu0 %v3886_v13 }
 0x14b   : > { %2597 = vmatprep.subr.bf16.mxu0 %v3892_v20 }
 0x14e   : > { %2599 = vmatpush1.bf16.msra.mxu0 %v3898_v24 }
 0x14f   : > { %2601 = vmatprep.subr.bf16.mxu0 %v3904_v33 }
 0x152   : > { %2603 = vmatpush1.bf16.msra.mxu0 %v3910_v42 }
 0x153   : > { %2605 = vmatprep.subr.bf16.mxu0 %v3914_v44 }
 0x156   : > { %2607 = vmatpush1.bf16.msra.mxu0 %v3918_v46 }
 0x157   : > { %2673 = vmatprep.subr.bf16.mxu0 %v3730_v17 }
 0x1b5   : > { %v959_v16 = vpop.f32.mrb[0].mxu1 }
 0x1b6   : > { %v961_v21 = vpop.f32.mrb[1].mxu1 }
 0x1ec   : > { %v4009_v22 = vpop.f32.mrb[0].mxu0 }
 0x1ed   : > { %v964_v23 = vadd.f32 %v959_v16, %v4009_v22  ;;  %v4012_v27 = vpop.f32.mrb[1].mxu0 }
 0x1ee   : > { %v965_v31 = vadd.f32 %v961_v21, %v4012_v27  ;;  %v4015_v32 = vpop.f32.mrb[2].mxu0 }
 0x1ef   : > { %3198 = vtanh.f32 %v964_v23  ;;  %v4017_v35 = vpop.f32.mrb[3].mxu0 }
 0x1f0   : > { %3200 = vtanh.f32 %v965_v31 }
 0x1f9   : > { %v3199_v36 = vpop.eup %3198 }
 0x1fa   : > { %v3201_v37 = vpop.eup %3200  ;;  %v968_v45 = vmul.f32 0.95, %v3199_v36 }
 0x1fb   : > { %v969_v43 = vmul.f32 0.95, %v3201_v37 }
 0x1fc   : > { %v1051_v63 = vmul.f32 0.05, %v968_v45 }
 0x1fd   : > { %1036 = vmatprep.mubr.f32.mxu1 %v969_v43  ;;  %v1052_v4 = vmul.f32 0.05, %v969_v43 }
 0x1fe   : > { %1037 = vmatmul.mubr.f32.vlgmr.msra.gmra.mrb[2].mxu1 %v968_v45 }
 0x1ff   : > { %2611 = vmatpush1.bf16.msra.mxu1 %v3740_v25 }
 0x200   : > { %2613 = vmatprep.subr.bf16.mxu1 %v3742_v26 }
 0x203   : > { %2615 = vmatpush1.bf16.msra.mxu1 %v3748_v30 }
 0x204   : > { %2617 = vmatprep.subr.bf16.mxu1 %v3754_v34 }
 0x207   : > { %2619 = vmatpush1.bf16.msra.mxu1 %v3762_v40 }
 0x208   : > { %2621 = vmatprep.subr.bf16.mxu1 %v3765_v41 }
 0x20b   : > { %2623 = vmatpush1.bf16.msra.mxu1 %v3774_v48 }
 0x20c   : > { %2625 = vmatprep.subr.bf16.mxu1 %v3777_v49 }
 0x20f   : > { %2627 = vmatpush1.bf16.msra.mxu1 %v3786_v56 }
 0x210   : > { %2629 = vmatprep.subr.bf16.mxu1 %v3789_v57 }
 0x213   : > { %2631 = vmatpush1.bf16.msra.mxu1 %v3798_v0 }
 0x214   : > { %2633 = vmatprep.subr.bf16.mxu1 %v3801_v2 }
 0x217   : > { %2635 = vmatpush1.bf16.msra.mxu1 %v3810_v9 }
 0x218   : > { %2637 = vmatprep.subr.bf16.mxu1 %v3813_v10 }
 0x21b   : > { %2639 = vmatpush1.bf16.msra.mxu1 %v3822_v18 }
 0x21c   : > { %2641 = vmatprep.subr.bf16.mxu1 %v3825_v19 }
 0x21f   : > { %2643 = vmatpush1.bf16.msra.mxu1 %v3834_v28 }
 0x220   : > { %2645 = vmatprep.subr.bf16.mxu1 %v3837_v29 }
 0x223   : > { %2647 = vmatpush1.bf16.msra.mxu1 %v3846_v38 }
 0x224   : > { %2649 = vmatprep.subr.bf16.mxu1 %v3849_v39 }
 0x227   : > { %2651 = vmatpush1.bf16.msra.mxu1 %v3859_v51 }
 0x228   : > { %2653 = vmatprep.subr.bf16.mxu1 %v3865_v55 }
 0x22b   : > { %2655 = vmatpush1.bf16.msra.mxu1 %v3874_v3 }
 0x22c   : > { %2657 = vmatprep.subr.bf16.mxu1 %v3880_v7 }
 0x22f   : > { %2659 = vmatpush1.bf16.msra.mxu1 %v3886_v13 }
 0x230   : > { %2661 = vmatprep.subr.bf16.mxu1 %v3892_v20 }
 0x233   : > { %2663 = vmatpush1.bf16.msra.mxu1 %v3898_v24 }
 0x234   : > { %2665 = vmatprep.subr.bf16.mxu1 %v3904_v33 }
 0x237   : > { %2667 = vmatpush1.bf16.msra.mxu1 %v3910_v42 }
 0x238   : > { %2669 = vmatprep.subr.bf16.mxu1 %v3914_v44 }
 0x23b   : > { %2671 = vmatpush1.bf16.msra.mxu1 %v3918_v46 }
 0x23c   : > { %2737 = vmatprep.subr.bf16.mxu1 %v3730_v17 }
 0x2d1   : > { %v1038_v47 = vpop.f32.mrb[2].mxu1 }
 0x2d2   : > { %v1045_v50 = vrot.slane %v1038_v47, 6  ;;  %v1040_v52 = vpop.f32.mrb[3].mxu1 }
 0x2d3   : > { %v1046_v53 = vrot.slane %v1040_v52, 6 }
 0x2d4   : > { %v1049_v54 = vadd.f32 %v1045_v50, %v4009_v22 }
 0x2d5   : > { %v1050_v58 = vadd.f32 %v1046_v53, %v4012_v27 }
 0x2d6   : > { %3202 = vtanh.f32 %v1049_v54 }
 0x2d7   : > { %3204 = vtanh.f32 %v1050_v58 }
 0x2e0   : > { %v3203_v1 = vpop.eup %3202 }
 0x2e1   : > { %v3205_v59 = vpop.eup %3204  ;;  %v1055_v60 = vmul.f32 0.95, %v3203_v1 }
 0x2e2   : > { %v1056_v61 = vmul.f32 0.95, %v3205_v59 }
 0x2e3   : > { %v1059_v62 = vrot.slane %v1055_v60, 2 }
 0x2e4   : > { %v1060_v5 = vrot.slane %v1056_v61, 2 }
 0x2e5   : > { %v1063_v6 = vadd.f32 %v1059_v62, %v1051_v63 }
 0x2e6   : > { %v1064_v8 = vadd.f32 %v1060_v5, %v1052_v4 }
 0x2e7   : > { %v1144_v45 = vmul.f32 0.05, %v1063_v6 }
 0x2e8   : > { %1129 = vmatprep.mubr.f32.mxu0 %v1064_v8  ;;  %v1145_v47 = vmul.f32 0.05, %v1064_v8 }
 0x2e9   : > { %1130 = vmatmul.mubr.f32.vlgmr.msra.gmra.mrb[4].mxu0 %v1063_v6 }
 0x2ea   : > { %2675 = vmatpush1.bf16.msra.mxu0 %v3740_v25 }
 0x2eb   : > { %2677 = vmatprep.subr.bf16.mxu0 %v3742_v26 }
 0x2ee   : > { %2679 = vmatpush1.bf16.msra.mxu0 %v3748_v30 }
 0x2ef   : > { %2681 = vmatprep.subr.bf16.mxu0 %v3754_v34 }
 0x2f2   : > { %2683 = vmatpush1.bf16.msra.mxu0 %v3762_v40 }
 0x2f3   : > { %2685 = vmatprep.subr.bf16.mxu0 %v3765_v41 }
 0x2f6   : > { %2687 = vmatpush1.bf16.msra.mxu0 %v3774_v48 }
 0x2f7   : > { %2689 = vmatprep.subr.bf16.mxu0 %v3777_v49 }
 0x2fa   : > { %2691 = vmatpush1.bf16.msra.mxu0 %v3786_v56 }
 0x2fb   : > { %2693 = vmatprep.subr.bf16.mxu0 %v3789_v57 }
 0x2fe   : > { %2695 = vmatpush1.bf16.msra.mxu0 %v3798_v0 }
 0x2ff   : > { %2697 = vmatprep.subr.bf16.mxu0 %v3801_v2 }
 0x302   : > { %2699 = vmatpush1.bf16.msra.mxu0 %v3810_v9 }
 0x303   : > { %2701 = vmatprep.subr.bf16.mxu0 %v3813_v10 }
 0x306   : > { %2703 = vmatpush1.bf16.msra.mxu0 %v3822_v18 }
 0x307   : > { %2705 = vmatprep.subr.bf16.mxu0 %v3825_v19 }
 0x30a   : > { %2707 = vmatpush1.bf16.msra.mxu0 %v3834_v28 }
 0x30b   : > { %2709 = vmatprep.subr.bf16.mxu0 %v3837_v29 }
 0x30e   : > { %2711 = vmatpush1.bf16.msra.mxu0 %v3846_v38 }
 0x30f   : > { %2713 = vmatprep.subr.bf16.mxu0 %v3849_v39 }
 0x312   : > { %2715 = vmatpush1.bf16.msra.mxu0 %v3859_v51 }
 0x313   : > { %2717 = vmatprep.subr.bf16.mxu0 %v3865_v55 }
 0x316   : > { %2719 = vmatpush1.bf16.msra.mxu0 %v3874_v3 }
 0x317   : > { %2721 = vmatprep.subr.bf16.mxu0 %v3880_v7 }
 0x31a   : > { %2723 = vmatpush1.bf16.msra.mxu0 %v3886_v13 }
 0x31b   : > { %2725 = vmatprep.subr.bf16.mxu0 %v3892_v20 }
 0x31e   : > { %2727 = vmatpush1.bf16.msra.mxu0 %v3898_v24 }
 0x31f   : > { %2729 = vmatprep.subr.bf16.mxu0 %v3904_v33 }
 0x322   : > { %2731 = vmatpush1.bf16.msra.mxu0 %v3910_v42 }
 0x323   : > { %2733 = vmatprep.subr.bf16.mxu0 %v3914_v44 }
 0x326   : > { %2735 = vmatpush1.bf16.msra.mxu0 %v3918_v46 }
 0x327   : > { %2801 = vmatprep.subr.bf16.mxu0 %v3730_v17 }
 0x3bc   : > { %v1131_v11 = vpop.f32.mrb[4].mxu0 }
 0x3bd   : > { %v1138_v12 = vrot.slane %v1131_v11, 4  ;;  %v1133_v14 = vpop.f32.mrb[5].mxu0 }
 0x3be   : > { %v1139_v15 = vrot.slane %v1133_v14, 4 }
 0x3bf   : > { %v1142_v16 = vadd.f32 %v1138_v12, %v4009_v22 }
 0x3c0   : > { %v1143_v21 = vadd.f32 %v1139_v15, %v4012_v27 }
 0x3c1   : > { %3206 = vtanh.f32 %v1142_v16 }
 0x3c2   : > { %3208 = vtanh.f32 %v1143_v21 }
 0x3cb   : > { %v3207_v23 = vpop.eup %3206 }
 0x3cc   : > { %v3209_v31 = vpop.eup %3208  ;;  %v1148_v36 = vmul.f32 0.95, %v3207_v23 }
 0x3cd   : > { %v1149_v37 = vmul.f32 0.95, %v3209_v31 }
 0x3ce   : > { %v1152_v43 = vrot.slane %v1148_v36, 4 }
 0x3cf   : > { %v1153_v50 = vrot.slane %v1149_v37, 4 }
 0x3d0   : > { %v1156_v52 = vadd.f32 %v1152_v43, %v1144_v45 }
 0x3d1   : > { %v1157_v53 = vadd.f32 %v1153_v50, %v1145_v47  ;;  %v3146_v50 = vld [vmem:[%s3707_s20 + $0xe4] ss:$16 sps:$4 sm:$0xff]  }
 0x3d2   : > { %v1237_v8 = vmul.f32 0.05, %v1156_v52 }
 0x3d3   : > { %1222 = vmatprep.mubr.f32.mxu1 %v1157_v53  ;;  %v1238_v11 = vmul.f32 0.05, %v1157_v53  ;;  %v3152_v53 = vld [vmem:[%s3707_s20 + $0x104] ss:$16 sps:$4 sm:$0xff]  }
 0x3d4   : > { %1223 = vmatmul.mubr.f32.vlgmr.msra.gmra.mrb[4].mxu1 %v1156_v52  ;;  %v3144_v52 = vld [vmem:[%s3707_s20 + $0xe0] ss:$16 sps:$4 sm:$0xff]  }
 0x3d5   : > { %2739 = vmatpush1.bf16.msra.mxu1 %v3740_v25 }
 0x3d6   : > { %2741 = vmatprep.subr.bf16.mxu1 %v3742_v26 }
 0x3d9   : > { %2743 = vmatpush1.bf16.msra.mxu1 %v3748_v30 }
 0x3da   : > { %2745 = vmatprep.subr.bf16.mxu1 %v3754_v34 }
 0x3dd   : > { %2747 = vmatpush1.bf16.msra.mxu1 %v3762_v40 }
 0x3de   : > { %2749 = vmatprep.subr.bf16.mxu1 %v3765_v41 }
 0x3e1   : > { %2751 = vmatpush1.bf16.msra.mxu1 %v3774_v48 }
 0x3e2   : > { %2753 = vmatprep.subr.bf16.mxu1 %v3777_v49 }
 0x3e5   : > { %2755 = vmatpush1.bf16.msra.mxu1 %v3786_v56 }
 0x3e6   : > { %2757 = vmatprep.subr.bf16.mxu1 %v3789_v57 }
 0x3e9   : > { %2759 = vmatpush1.bf16.msra.mxu1 %v3798_v0 }
 0x3ea   : > { %2761 = vmatprep.subr.bf16.mxu1 %v3801_v2 }
 0x3ed   : > { %2763 = vmatpush1.bf16.msra.mxu1 %v3810_v9 }
 0x3ee   : > { %2765 = vmatprep.subr.bf16.mxu1 %v3813_v10 }
 0x3f1   : > { %2767 = vmatpush1.bf16.msra.mxu1 %v3822_v18 }
 0x3f2   : > { %2769 = vmatprep.subr.bf16.mxu1 %v3825_v19 }
 0x3f5   : > { %2771 = vmatpush1.bf16.msra.mxu1 %v3834_v28 }
 0x3f6   : > { %2773 = vmatprep.subr.bf16.mxu1 %v3837_v29 }
 0x3f9   : > { %2775 = vmatpush1.bf16.msra.mxu1 %v3846_v38 }
 0x3fa   : > { %2777 = vmatprep.subr.bf16.mxu1 %v3849_v39 }
 0x3fd   : > { %2779 = vmatpush1.bf16.msra.mxu1 %v3859_v51 }
 0x3fe   : > { %2781 = vmatprep.subr.bf16.mxu1 %v3865_v55 }
 0x401   : > { %2783 = vmatpush1.bf16.msra.mxu1 %v3874_v3 }
 0x402   : > { %2785 = vmatprep.subr.bf16.mxu1 %v3880_v7 }
 0x405   : > { %2787 = vmatpush1.bf16.msra.mxu1 %v3886_v13 }
 0x406   : > { %2789 = vmatprep.subr.bf16.mxu1 %v3892_v20 }
 0x409   : > { %2791 = vmatpush1.bf16.msra.mxu1 %v3898_v24 }
 0x40a   : > { %2793 = vmatprep.subr.bf16.mxu1 %v3904_v33 }
 0x40d   : > { %2795 = vmatpush1.bf16.msra.mxu1 %v3910_v42 }
 0x40e   : > { %2797 = vmatprep.subr.bf16.mxu1 %v3914_v44 }
 0x411   : > { %2799 = vmatpush1.bf16.msra.mxu1 %v3918_v46 }
 0x412   : > { %2865 = vmatprep.subr.bf16.mxu1 %v3730_v17 }
 0x4a7   : > { %v1224_v54 = vpop.f32.mrb[4].mxu1 }
 0x4a8   : > { %v1231_v58 = vrot.slane %v1224_v54, 2  ;;  %v1226_v1 = vpop.f32.mrb[5].mxu1  ;;  %v3150_v54 = vld [vmem:[%s3707_s20 + $0x100] ss:$16 sps:$4 sm:$0xff]  }
 0x4a9   : > { %v1232_v59 = vrot.slane %v1226_v1, 2  ;;  %v3156_v1 = vld [vmem:[%s3707_s20 + $0x120] ss:$16 sps:$4 sm:$0xff]  }
 0x4aa   : > { %v1235_v60 = vadd.f32 %v1231_v58, %v4009_v22  ;;  %v3158_v58 = vld [vmem:[%s3707_s20 + $0x124] ss:$16 sps:$4 sm:$0xff]  }
 0x4ab   : > { %v1236_v61 = vadd.f32 %v1232_v59, %v4012_v27 }
 0x4ac   : > { %3210 = vtanh.f32 %v1235_v60 }
 0x4ad   : > { %3212 = vtanh.f32 %v1236_v61 }
 0x4b6   : > { %v3211_v62 = vpop.eup %3210 }
 0x4b7   : > { %v3213_v63 = vpop.eup %3212  ;;  %v1241_v4 = vmul.f32 0.95, %v3211_v62 }
 0x4b8   : > { %v1242_v5 = vmul.f32 0.95, %v3213_v63 }
 0x4b9   : > { %v1245_v6 = vrot.slane %v1241_v4, 6 }
 0x4ba   : > { %v1246_v12 = vrot.slane %v1242_v5, 6 }
 0x4bb   : > { %v1249_v14 = vadd.f32 %v1245_v6, %v1237_v8 }
 0x4bc   : > { %v1250_v17 = vadd.f32 %v1246_v12, %v1238_v11 }
 0x4bd   : > { %v1324_v31 = vmul.f32 0.05, %v1249_v14 }
 0x4be   : > { %1315 = vmatprep.mubr.f32.mxu0 %v1250_v17  ;;  %v1325_v43 = vmul.f32 0.05, %v1250_v17 }
 0x4bf   : > { %1316 = vmatmul.mubr.f32.vlgmr.msra.gmra.mrb[6].mxu0 %v1249_v14 }
 0x4c0   : > { %2803 = vmatpush1.bf16.msra.mxu0 %v3740_v25 }
 0x4c1   : > { %2805 = vmatprep.subr.bf16.mxu0 %v3742_v26 }
 0x4c4   : > { %2807 = vmatpush1.bf16.msra.mxu0 %v3748_v30 }
 0x4c5   : > { %2809 = vmatprep.subr.bf16.mxu0 %v3754_v34 }
 0x4c8   : > { %2811 = vmatpush1.bf16.msra.mxu0 %v3762_v40 }
 0x4c9   : > { %2813 = vmatprep.subr.bf16.mxu0 %v3765_v41 }
 0x4cc   : > { %2815 = vmatpush1.bf16.msra.mxu0 %v3774_v48 }
 0x4cd   : > { %2817 = vmatprep.subr.bf16.mxu0 %v3777_v49 }
 0x4d0   : > { %2819 = vmatpush1.bf16.msra.mxu0 %v3786_v56 }
 0x4d1   : > { %2821 = vmatprep.subr.bf16.mxu0 %v3789_v57 }
 0x4d4   : > { %2823 = vmatpush1.bf16.msra.mxu0 %v3798_v0 }
 0x4d5   : > { %2825 = vmatprep.subr.bf16.mxu0 %v3801_v2 }
 0x4d8   : > { %2827 = vmatpush1.bf16.msra.mxu0 %v3810_v9 }
 0x4d9   : > { %2829 = vmatprep.subr.bf16.mxu0 %v3813_v10 }
 0x4dc   : > { %2831 = vmatpush1.bf16.msra.mxu0 %v3822_v18 }
 0x4dd   : > { %2833 = vmatprep.subr.bf16.mxu0 %v3825_v19 }
 0x4e0   : > { %2835 = vmatpush1.bf16.msra.mxu0 %v3834_v28 }
 0x4e1   : > { %2837 = vmatprep.subr.bf16.mxu0 %v3837_v29 }
 0x4e4   : > { %2839 = vmatpush1.bf16.msra.mxu0 %v3846_v38 }
 0x4e5   : > { %2841 = vmatprep.subr.bf16.mxu0 %v3849_v39 }
 0x4e8   : > { %2843 = vmatpush1.bf16.msra.mxu0 %v3859_v51 }
 0x4e9   : > { %2845 = vmatprep.subr.bf16.mxu0 %v3865_v55 }
 0x4ec   : > { %2847 = vmatpush1.bf16.msra.mxu0 %v3874_v3 }
 0x4ed   : > { %2849 = vmatprep.subr.bf16.mxu0 %v3880_v7 }
 0x4f0   : > { %2851 = vmatpush1.bf16.msra.mxu0 %v3886_v13 }
 0x4f1   : > { %2853 = vmatprep.subr.bf16.mxu0 %v3892_v20 }
 0x4f4   : > { %2855 = vmatpush1.bf16.msra.mxu0 %v3898_v24 }
 0x4f5   : > { %2857 = vmatprep.subr.bf16.mxu0 %v3904_v33 }
 0x4f8   : > { %2859 = vmatpush1.bf16.msra.mxu0 %v3910_v42 }
 0x4f9   : > { %2861 = vmatprep.subr.bf16.mxu0 %v3914_v44 }
 0x4fc   : > { %2863 = vmatpush1.bf16.msra.mxu0 %v3918_v46 }
 0x592   : > { %v1317_v22 = vpop.f32.mrb[6].mxu0 }
 0x593   : > { %v1322_v27 = vadd.f32 %v1317_v22, %v4015_v32  ;;  %v1319_v15 = vpop.f32.mrb[7].mxu0 }
 0x594   : > { %v1323_v16 = vadd.f32 %v1319_v15, %v4017_v35 }
 0x595   : > { %3214 = vtanh.f32 %v1322_v27 }
 0x596   : > { %3216 = vtanh.f32 %v1323_v16  ;;  %v3105_v16 = vld [vmem:[%s3707_s20 + $0x8] ss:$16 sps:$4 sm:$0xff]  }
 0x59f   : > { %v3215_v21 = vpop.eup %3214 }
 0x5a0   : > { %v3217_v23 = vpop.eup %3216  ;;  %v1328_v36 = vmul.f32 0.95, %v3215_v21  ;;  %v3113_v21 = vld [vmem:[%s3707_s20 + $0x2c] ss:$16 sps:$4 sm:$0xff]  }
 0x5a1   : > { %v1329_v37 = vmul.f32 0.95, %v3217_v23  ;;  %v3111_v23 = vld [vmem:[%s3707_s20 + $0x28] ss:$16 sps:$4 sm:$0xff]  }
 0x5a2   : > { %v1330_v45 = vadd.f32 %v1328_v36, %v1324_v31  ;;  %v3119_v31 = vld [vmem:[%s3707_s20 + $0x4c] ss:$16 sps:$4 sm:$0xff]   ;;  %v3117_v36 = vld [vmem:[%s3707_s20 + $0x48] ss:$16 sps:$4 sm:$0xff]  }
 0x5a3   : > { %v1331_v47 = vadd.f32 %v1329_v37, %v1325_v43  ;;  %v3125_v37 = vld [vmem:[%s3707_s20 + $0x6c] ss:$16 sps:$4 sm:$0xff]   ;;  %v3123_v43 = vld [vmem:[%s3707_s20 + $0x68] ss:$16 sps:$4 sm:$0xff]  }
 0x5a5   : > { %1396 = vmatprep.mubr.f32.mxu1 %v1331_v47 }
 0x5a6   : > { %1397 = vmatmul.mubr.f32.vlgmr.msra.gmra.mrb[6].mxu1 %v1330_v45 }
 0x5a7   : > { %2867 = vmatpush1.bf16.msra.mxu1 %v3740_v25 }
 0x5a8   : > { %2869 = vmatprep.subr.bf16.mxu1 %v3742_v26 }
 0x5ab   : > { %2871 = vmatpush1.bf16.msra.mxu1 %v3748_v30 }
 0x5ac   : > { %2873 = vmatprep.subr.bf16.mxu1 %v3754_v34 }
 0x5af   : > { %2875 = vmatpush1.bf16.msra.mxu1 %v3762_v40 }
 0x5b0   : > { %2877 = vmatprep.subr.bf16.mxu1 %v3765_v41 }
 0x5b3   : > { %2879 = vmatpush1.bf16.msra.mxu1 %v3774_v48 }
 0x5b4   : > { %2881 = vmatprep.subr.bf16.mxu1 %v3777_v49 }
 0x5b7   : > { %2883 = vmatpush1.bf16.msra.mxu1 %v3786_v56 }
 0x5b8   : > { %2885 = vmatprep.subr.bf16.mxu1 %v3789_v57 }
 0x5bb   : > { %2887 = vmatpush1.bf16.msra.mxu1 %v3798_v0  ;;  %v1411_v0 = vmul.f32 0.05, %v1330_v45  ;;  %v3131_v45 = vld [vmem:[%s3707_s20 + $0x8c] ss:$16 sps:$4 sm:$0xff]  }
 0x5bc   : > { %2889 = vmatprep.subr.bf16.mxu1 %v3801_v2 }
 0x5bf   : > { %2891 = vmatpush1.bf16.msra.mxu1 %v3810_v9  ;;  %v1412_v9 = vmul.f32 0.05, %v1331_v47  ;;  %v3129_v47 = vld [vmem:[%s3707_s20 + $0x88] ss:$16 sps:$4 sm:$0xff]  }
 0x5c0   : > { %2893 = vmatprep.subr.bf16.mxu1 %v3813_v10 }
 0x5c3   : > { %2895 = vmatpush1.bf16.msra.mxu1 %v3822_v18 }
 0x5c4   : > { %2897 = vmatprep.subr.bf16.mxu1 %v3825_v19 }
 0x5c7   : > { %2899 = vmatpush1.bf16.msra.mxu1 %v3834_v28  ;;  %v3102_v28 = vld [vmem:[%s3707_s20] ss:$16 sps:$4 sm:$0xff]  }
 0x5c8   : > { %2901 = vmatprep.subr.bf16.mxu1 %v3837_v29  ;;  %v3104_v29 = vld [vmem:[%s3707_s20 + $0x4] ss:$16 sps:$4 sm:$0xff]  }
 0x5c9   : > { %1997 = vmatprep.subr.bf16.mxu0 %v3104_v29  ;;  %v3171_v29 = vld [vmem:[%s3707_s20 + $0x168] ss:$16 sps:$4 sm:$0xff]  }
 0x5cb   : > { %2903 = vmatpush1.bf16.msra.mxu1 %v3846_v38  ;;  %v3107_v38 = vld [vmem:[%s3707_s20 + $0xc] ss:$16 sps:$4 sm:$0xff]  }
 0x5cc   : > { %2905 = vmatprep.subr.bf16.mxu1 %v3849_v39  ;;  %v3110_v39 = vld [vmem:[%s3707_s20 + $0x24] ss:$16 sps:$4 sm:$0xff]  }
 0x5cf   : > { %2907 = vmatpush1.bf16.msra.mxu1 %v3859_v51  ;;  %v3108_v51 = vld [vmem:[%s3707_s20 + $0x20] ss:$16 sps:$4 sm:$0xff]  }
 0x5d0   : > { %2909 = vmatprep.subr.bf16.mxu1 %v3865_v55  ;;  %v3116_v55 = vld [vmem:[%s3707_s20 + $0x44] ss:$16 sps:$4 sm:$0xff]  }
 0x5d3   : > { %2911 = vmatpush1.bf16.msra.mxu1 %v3874_v3  ;;  %v3114_v3 = vld [vmem:[%s3707_s20 + $0x40] ss:$16 sps:$4 sm:$0xff]  }
 0x5d4   : > { %2913 = vmatprep.subr.bf16.mxu1 %v3880_v7  ;;  %v3122_v7 = vld [vmem:[%s3707_s20 + $0x64] ss:$16 sps:$4 sm:$0xff]  }
 0x5d7   : > { %2915 = vmatpush1.bf16.msra.mxu1 %v3886_v13  ;;  %v3120_v13 = vld [vmem:[%s3707_s20 + $0x60] ss:$16 sps:$4 sm:$0xff]  }
 0x5d8   : > { %2917 = vmatprep.subr.bf16.mxu1 %v3892_v20  ;;  %v3128_v20 = vld [vmem:[%s3707_s20 + $0x84] ss:$16 sps:$4 sm:$0xff]  }
 0x5db   : > { %2919 = vmatpush1.bf16.msra.mxu1 %v3898_v24  ;;  %v3126_v24 = vld [vmem:[%s3707_s20 + $0x80] ss:$16 sps:$4 sm:$0xff]  }
 0x5dc   : > { %2921 = vmatprep.subr.bf16.mxu1 %v3904_v33  ;;  %v3134_v33 = vld [vmem:[%s3707_s20 + $0xa4] ss:$16 sps:$4 sm:$0xff]  }
 0x5df   : > { %2923 = vmatpush1.bf16.msra.mxu1 %v3910_v42  ;;  %v3132_v42 = vld [vmem:[%s3707_s20 + $0xa0] ss:$16 sps:$4 sm:$0xff]  }
 0x5e0   : > { %2925 = vmatprep.subr.bf16.mxu1 %v3914_v44  ;;  %v3140_v44 = vld [vmem:[%s3707_s20 + $0xc4] ss:$16 sps:$4 sm:$0xff]  }
 0x5e3   : > { %2927 = vmatpush1.bf16.msra.mxu1 %v3918_v46  ;;  %v3138_v46 = vld [vmem:[%s3707_s20 + $0xc0] ss:$16 sps:$4 sm:$0xff]  }
 0x5e4   : > { %2038 = vmatprep.subr.bf16.mxu1 %v3107_v38  ;;  %v3176_v38 = vld [vmem:[%s3707_s20 + $0x184] ss:$16 sps:$4 sm:$0xff]  }
 0x679   : > { %v1398_v25 = vpop.f32.mrb[6].mxu1 }
 0x67a   : > { %v1405_v26 = vrot.slane %v1398_v25, 6  ;;  %v1400_v30 = vpop.f32.mrb[7].mxu1  ;;  %v3137_v25 = vld [vmem:[%s3707_s20 + $0xac] ss:$16 sps:$4 sm:$0xff]  }
 0x67b   : > { %v1406_v34 = vrot.slane %v1400_v30, 6  ;;  %v3143_v30 = vld [vmem:[%s3707_s20 + $0xcc] ss:$16 sps:$4 sm:$0xff]  }
 0x67c   : > { %v1409_v40 = vadd.f32 %v1405_v26, %v4015_v32  ;;  %v3135_v26 = vld [vmem:[%s3707_s20 + $0xa8] ss:$16 sps:$4 sm:$0xff]  }
 0x67d   : > { %v1410_v41 = vadd.f32 %v1406_v34, %v4017_v35  ;;  %v3141_v34 = vld [vmem:[%s3707_s20 + $0xc8] ss:$16 sps:$4 sm:$0xff]  }
 0x67e   : > { %3218 = vtanh.f32 %v1409_v40  ;;  %v3149_v40 = vld [vmem:[%s3707_s20 + $0xec] ss:$16 sps:$4 sm:$0xff]  }
 0x67f   : > { %3220 = vtanh.f32 %v1410_v41  ;;  %v3147_v41 = vld [vmem:[%s3707_s20 + $0xe8] ss:$16 sps:$4 sm:$0xff]  }
 0x688   : > { %v3219_v48 = vpop.eup %3218 }
 0x689   : > { %v3221_v49 = vpop.eup %3220  ;;  %v1415_v56 = vmul.f32 0.95, %v3219_v48  ;;  %v3155_v48 = vld [vmem:[%s3707_s20 + $0x10c] ss:$16 sps:$4 sm:$0xff]  }
 0x68a   : > { %v1416_v57 = vmul.f32 0.95, %v3221_v49  ;;  %v3153_v49 = vld [vmem:[%s3707_s20 + $0x108] ss:$16 sps:$4 sm:$0xff]  }
 0x68b   : > { %v1419_v2 = vrot.slane %v1415_v56, 2  ;;  %v3161_v56 = vld [vmem:[%s3707_s20 + $0x12c] ss:$16 sps:$4 sm:$0xff]  }
 0x68c   : > { %v1420_v10 = vrot.slane %v1416_v57, 2  ;;  %v3159_v57 = vld [vmem:[%s3707_s20 + $0x128] ss:$16 sps:$4 sm:$0xff]  }
 0x68d   : > { %v1423_v18 = vadd.f32 %v1419_v2, %v1411_v0  ;;  %v3164_v0 = vld [vmem:[%s3707_s20 + $0x144] ss:$16 sps:$4 sm:$0xff]   ;;  %v3167_v2 = vld [vmem:[%s3707_s20 + $0x14c] ss:$16 sps:$4 sm:$0xff]  }
 0x68e   : > { %v1424_v19 = vadd.f32 %v1420_v10, %v1412_v9  ;;  %v3162_v9 = vld [vmem:[%s3707_s20 + $0x140] ss:$16 sps:$4 sm:$0xff]   ;;  %v3165_v10 = vld [vmem:[%s3707_s20 + $0x148] ss:$16 sps:$4 sm:$0xff]  }
 0x68f   : > { %v1504_v14 = vmul.f32 0.05, %v1423_v18 }
 0x690   : > { %1489 = vmatprep.mubr.f32.mxu0 %v1424_v19  ;;  %v1505_v17 = vmul.f32 0.05, %v1424_v19  ;;  %v3173_v19 = vld [vmem:[%s3707_s20 + $0x16c] ss:$16 sps:$4 sm:$0xff]  }
 0x691   : > { %1490 = vmatmul.mubr.f32.vlgmr.msra.gmra.mrb[8].mxu0 %v1423_v18  ;;  %v3170_v18 = vld [vmem:[%s3707_s20 + $0x164] ss:$16 sps:$4 sm:$0xff]  }
 0x692   : > { %1998 = vmatpush1.bf16.msra.mxu0 %v3102_v28  ;;  %v3168_v28 = vld [vmem:[%s3707_s20 + $0x160] ss:$16 sps:$4 sm:$0xff]  }
 0x693   : > { %1999 = vmatprep.subr.bf16.mxu0 %v3110_v39  ;;  %v3179_v39 = vld [vmem:[%s3707_s20 + $0x18c] ss:$16 sps:$4 sm:$0xff]  }
 0x696   : > { %2000 = vmatpush1.bf16.msra.mxu0 %v3108_v51  ;;  %v3174_v51 = vld [vmem:[%s3707_s20 + $0x180] ss:$16 sps:$4 sm:$0xff]  }
 0x697   : > { %2001 = vmatprep.subr.bf16.mxu0 %v3116_v55  ;;  %v3177_v55 = vld [vmem:[%s3707_s20 + $0x188] ss:$16 sps:$4 sm:$0xff]  }
 0x69a   : > { %2002 = vmatpush1.bf16.msra.mxu0 %v3114_v3  ;;  %v3182_v3 = vld [vmem:[%s3707_s20 + $0x1a4] ss:$16 sps:$4 sm:$0xff]  }
 0x69b   : > { %2003 = vmatprep.subr.bf16.mxu0 %v3122_v7  ;;  %v3185_v7 = vld [vmem:[%s3707_s20 + $0x1ac] ss:$16 sps:$4 sm:$0xff]  }
 0x69e   : > { %2004 = vmatpush1.bf16.msra.mxu0 %v3120_v13  ;;  %v3180_v13 = vld [vmem:[%s3707_s20 + $0x1a0] ss:$16 sps:$4 sm:$0xff]  }
 0x69f   : > { %2005 = vmatprep.subr.bf16.mxu0 %v3128_v20  ;;  %v3183_v20 = vld [vmem:[%s3707_s20 + $0x1a8] ss:$16 sps:$4 sm:$0xff]  }
 0x6a2   : > { %2006 = vmatpush1.bf16.msra.mxu0 %v3126_v24  ;;  %v3188_v24 = vld [vmem:[%s3707_s20 + $0x1c4] ss:$16 sps:$4 sm:$0xff]  }
 0x6a3   : > { %2007 = vmatprep.subr.bf16.mxu0 %v3134_v33  ;;  %v3191_v33 = vld [vmem:[%s3707_s20 + $0x1cc] ss:$16 sps:$4 sm:$0xff]  }
 0x6a6   : > { %2008 = vmatpush1.bf16.msra.mxu0 %v3132_v42  ;;  %v3186_v42 = vld [vmem:[%s3707_s20 + $0x1c0] ss:$16 sps:$4 sm:$0xff]  }
 0x6a7   : > { %2009 = vmatprep.subr.bf16.mxu0 %v3140_v44  ;;  %v3189_v44 = vld [vmem:[%s3707_s20 + $0x1c8] ss:$16 sps:$4 sm:$0xff]  }
 0x6aa   : > { %2010 = vmatpush1.bf16.msra.mxu0 %v3138_v46  ;;  %v3192_v46 = vld [vmem:[%s3707_s20 + $0x1e0] ss:$16 sps:$4 sm:$0xff]  }
 0x6ab   : > { %2011 = vmatprep.subr.bf16.mxu0 %v3146_v50  ;;  %v3194_v50 = vld [vmem:[%s3707_s20 + $0x1e4] ss:$16 sps:$4 sm:$0xff]  }
 0x6ae   : > { %2012 = vmatpush1.bf16.msra.mxu0 %v3144_v52  ;;  %v3195_v52 = vld [vmem:[%s3707_s20 + $0x1e8] ss:$16 sps:$4 sm:$0xff]  }
 0x6af   : > { %2013 = vmatprep.subr.bf16.mxu0 %v3152_v53  ;;  %v3197_v53 = vld [vmem:[%s3707_s20 + $0x1ec] ss:$16 sps:$4 sm:$0xff]  }
 0x6b2   : > { %2014 = vmatpush1.bf16.msra.mxu0 %v3150_v54 }
 0x6b3   : > { %2015 = vmatprep.subr.bf16.mxu0 %v3158_v58 }
 0x6b6   : > { %2016 = vmatpush1.bf16.msra.mxu0 %v3156_v1 }
 0x6b7   : > { %2017 = vmatprep.subr.bf16.mxu0 %v3164_v0 }
 0x6ba   : > { %2018 = vmatpush1.bf16.msra.mxu0 %v3162_v9 }
 0x6bb   : > { %2019 = vmatprep.subr.bf16.mxu0 %v3170_v18 }
 0x6be   : > { %2020 = vmatpush1.bf16.msra.mxu0 %v3168_v28 }
 0x6bf   : > { %2021 = vmatprep.subr.bf16.mxu0 %v3176_v38 }
 0x6c2   : > { %2022 = vmatpush1.bf16.msra.mxu0 %v3174_v51 }
 0x6c3   : > { %2023 = vmatprep.subr.bf16.mxu0 %v3182_v3 }
 0x6c6   : > { %2024 = vmatpush1.bf16.msra.mxu0 %v3180_v13 }
 0x6c7   : > { %2025 = vmatprep.subr.bf16.mxu0 %v3188_v24 }
 0x6ca   : > { %2026 = vmatpush1.bf16.msra.mxu0 %v3186_v42 }
 0x6cb   : > { %2027 = vmatprep.subr.bf16.mxu0 %v3194_v50 }
 0x6ce   : > { %2028 = vmatpush1.bf16.msra.mxu0 %v3192_v46 }
 0x764   : > { %v1491_v59 = vpop.f32.mrb[8].mxu0 }
 0x765   : > { %v1498_v60 = vrot.slane %v1491_v59, 4  ;;  %v1493_v61 = vpop.f32.mrb[9].mxu0 }
 0x766   : > { %v1499_v62 = vrot.slane %v1493_v61, 4 }
 0x767   : > { %v1502_v63 = vadd.f32 %v1498_v60, %v4015_v32 }
 0x768   : > { %v1503_v4 = vadd.f32 %v1499_v62, %v4017_v35 }
 0x769   : > { %3222 = vtanh.f32 %v1502_v63 }
 0x76a   : > { %3224 = vtanh.f32 %v1503_v4 }
 0x773   : > { %v3223_v5 = vpop.eup %3222 }
 0x774   : > { %v3225_v6 = vpop.eup %3224  ;;  %v1508_v8 = vmul.f32 0.95, %v3223_v5 }
 0x775   : > { %v1509_v11 = vmul.f32 0.95, %v3225_v6 }
 0x776   : > { %v1512_v12 = vrot.slane %v1508_v8, 4 }
 0x777   : > { %v1513_v22 = vrot.slane %v1509_v11, 4 }
 0x778   : > { %v4210_v27 = vadd.f32 %v1512_v12, %v1504_v14 }
 0x779   : > { %v4212_v15 = vadd.f32 %v1513_v22, %v1505_v17 }
 0x77a   : > { %v1597_v6 = vmul.f32 0.05, %v4210_v27 }
 0x77b   : > { %1582 = vmatprep.mubr.f32.mxu1 %v4212_v15  ;;  %v1598_v11 = vmul.f32 0.05, %v4212_v15 }
 0x77c   : > { %1583 = vmatmul.mubr.f32.vlgmr.msra.gmra.mrb[8].mxu1 %v4210_v27 }
 0x77d   : > { %2039 = vmatpush1.bf16.msra.mxu1 %v3105_v16 }
 0x77e   : > { %2040 = vmatprep.subr.bf16.mxu1 %v3113_v21  ;;  %v2088_v21 = vlaneseq }
 0x781   : > { %2041 = vmatpush1.bf16.msra.mxu1 %v3111_v23 }
 0x782   : > { %2042 = vmatprep.subr.bf16.mxu1 %v3119_v31  ;;  %v2089_v31 = vshrl.u32 %v2088_v21, 7 }
 0x785   : > { %2043 = vmatpush1.bf16.msra.mxu1 %v3117_v36 }
 0x786   : > { %2044 = vmatprep.subr.bf16.mxu1 %v3125_v37 }
 0x789   : > { %2045 = vmatpush1.bf16.msra.mxu1 %v3123_v43 }
 0x78a   : > { %2046 = vmatprep.subr.bf16.mxu1 %v3131_v45 }
 0x78d   : > { %2047 = vmatpush1.bf16.msra.mxu1 %v3129_v47 }
 0x78e   : > { %2048 = vmatprep.subr.bf16.mxu1 %v3137_v25 }
 0x791   : > { %2049 = vmatpush1.bf16.msra.mxu1 %v3135_v26 }
 0x792   : > { %2050 = vmatprep.subr.bf16.mxu1 %v3143_v30 }
 0x795   : > { %2051 = vmatpush1.bf16.msra.mxu1 %v3141_v34 }
 0x796   : > { %2052 = vmatprep.subr.bf16.mxu1 %v3149_v40 }
 0x799   : > { %2053 = vmatpush1.bf16.msra.mxu1 %v3147_v41 }
 0x79a   : > { %2054 = vmatprep.subr.bf16.mxu1 %v3155_v48 }
 0x79d   : > { %2055 = vmatpush1.bf16.msra.mxu1 %v3153_v49 }
 0x79e   : > { %2056 = vmatprep.subr.bf16.mxu1 %v3161_v56 }
 0x7a1   : > { %2057 = vmatpush1.bf16.msra.mxu1 %v3159_v57 }
 0x7a2   : > { %2058 = vmatprep.subr.bf16.mxu1 %v3167_v2 }
 0x7a5   : > { %2059 = vmatpush1.bf16.msra.mxu1 %v3165_v10 }
 0x7a6   : > { %2060 = vmatprep.subr.bf16.mxu1 %v3173_v19 }
 0x7a9   : > { %2061 = vmatpush1.bf16.msra.mxu1 %v3171_v29 }
 0x7aa   : > { %2062 = vmatprep.subr.bf16.mxu1 %v3179_v39 }
 0x7ad   : > { %2063 = vmatpush1.bf16.msra.mxu1 %v3177_v55 }
 0x7ae   : > { %2064 = vmatprep.subr.bf16.mxu1 %v3185_v7 }
 0x7b1   : > { %2065 = vmatpush1.bf16.msra.mxu1 %v3183_v20 }
 0x7b2   : > { %2066 = vmatprep.subr.bf16.mxu1 %v3191_v33 }
 0x7b5   : > { %2067 = vmatpush1.bf16.msra.mxu1 %v3189_v44 }
 0x7b6   : > { %2068 = vmatprep.subr.bf16.mxu1 %v3197_v53 }
 0x7b9   : > { %2069 = vmatpush1.bf16.msra.mxu1 %v3195_v52 }
 0x84f   : > { %v1584_v54 = vpop.f32.mrb[8].mxu1 }
 0x850   : > { %v1591_v58 = vrot.slane %v1584_v54, 2  ;;  %v1586_v1 = vpop.f32.mrb[9].mxu1 }
 0x851   : > { %v1592_v59 = vrot.slane %v1586_v1, 2 }
 0x852   : > { %v1595_v60 = vadd.f32 %v1591_v58, %v4015_v32  ;;  %v3436_v32 = vmov 1983009808  }
 0x853   : > { %v1596_v61 = vadd.f32 %v1592_v59, %v4017_v35  ;;  %v2086_v35 = vunpack.c.l.s4 %v3436_v32 }
 0x854   : > { %3226 = vtanh.f32 %v1595_v60 }
 0x855   : > { %3228 = vtanh.f32 %v1596_v61  ;;  %v2087_v23 = vunpack.c.0.s8 %v2086_v35 }
 0x857   : > { %v2090_v37 = vsub.s32 %v2087_v23, %v2089_v31 }
 0x85e   : > { %v3227_v62 = vpop.eup %3226 }
 0x85f   : > { %v3229_v63 = vpop.eup %3228  ;;  %v1601_v4 = vmul.f32 0.95, %v3227_v62 }
 0x860   : > { %v1602_v5 = vmul.f32 0.95, %v3229_v63 }
 0x861   : > { %v1605_v8 = vrot.slane %v1601_v4, 6 }
 0x862   : > { %v1606_v12 = vrot.slane %v1602_v5, 6 }
 0x863   : > { %v1609_v14 = vadd.f32 %v1605_v8, %v1597_v6 }
 0x864   : > { %v1610_v17 = vadd.f32 %v1606_v12, %v1598_v11 }
 0x865   : > { %v1611_v16 = vpack.c.bf16 %v1609_v14, %v1609_v14 }
 0x866   : > { %v1612_v22 = vpack.c.bf16 %v1610_v17, %v1610_v17 }
 0x868   : > { %2029 = vmatprep.mubr.bf16.mxu0 %v1612_v22  ;;  %2070 = vmatprep.mubr.bf16.mxu1 %v1612_v22 }
 0x869   : > { %2030 = vmatmul.mubr.bf16.vlgmr.msra.gmra.mrb[12].mxu0 %v1611_v16  ;;  %2071 = vmatmul.mubr.bf16.vlgmr.msra.gmra.mrb[12].mxu1 %v1611_v16 }
 0x93c   : > { %v2031_v27 = vpop.f32.mrb[12].mxu0  ;;  %v2072_v36 = vpop.f32.mrb[12].mxu1 }
 0x93d   : > { %v2033_v15 = vpop.f32.mrb[13].mxu0  ;;  %v2074_v43 = vpop.f32.mrb[13].mxu1 }
 0x93e   : > { %v2083_v45 = vcombine.low %v2031_v27, %v2033_v15  ;;  %v2084_v47 = vcombine.low %v2072_v36, %v2074_v43  ;;  %v2035_v25 = vpop.f32.mrb[14].mxu0  ;;  %v2076_v26 = vpop.f32.mrb[14].mxu1 }
 0x93f   : > { %v2036_v30 = vpop.f32.mrb[15].mxu0  ;;  %v2077_v34 = vpop.f32.mrb[15].mxu1 }
 0x940   : > { %v2091_v40 = vrot.slane %v2083_v45, %v2090_v37  ;;  %v2098_v41 = vrot.slane %v2084_v47, %v2090_v37 }
 0x942   : > { %v2099_v48 = vcombine.low %v2091_v40, %v2098_v41 }
 0x944   : > { %2101 = vst [vmem:[%s332_s7] sm:$0xff] %v2099_v48 }
 0x945   : > { %3363 = shalt.err (!%p3360_p5)
}
 0x946   : > { %s3364_s14 = scalar_lea.hbm %s4268_s5, 128  ;;  %s3368_s28 = scalar_lea.hbm %s4316_s4, 256 }
 0x947   : > { %p3365_p1 = scmp.ne.s32.totalorder %s4268_s5, %s3364_s14  ;;  %p3369_p12 = scmp.lt.u32.totalorder %s4268_s5, %s4316_s4 }
 0x948   : > { %p3370_p2 = scmp.lt.u32.totalorder %s3368_s28, %s3364_s14  ;;  %p3372_p13 = scmp.lt.u32.totalorder %s3364_s14, %s4268_s5 }
 0x949   : > { %p3366_p7 = pnand %p3365_p1, %p4335_p0 }
 0x94a   : > { %p3371_p9 = por %p3370_p2, %p3369_p12 }
 0x94b   : > { %p3367_p6 = pneg %p3366_p7 }
 0x94c   : > { %p3373_p8 = por %p3372_p13, %p3371_p9 }
 0x94e   : > { %p3374_p10 = pnand %p3373_p8, %p3367_p6 }
 0x950   : > { %3377 = shalt.err (!%p3374_p10)
}
 0x951   : > { %2940 = dma.vmem_to_hbm [thread:$0]  (%p4335_p0), %s4270_s23, 128, %s4268_s5, %s2103_s13  }
 0x952 PF: > { %s2129_s8 = sand.u32 1, %s3412_s15   ;;  %p4336_p11 = scmp.ne.s32.totalorder %s4326_s27, 0 }
 0x953   : > { %p4337_p4 = scmp.ge.s32.totalorder %s3424_s18, 2  ;;  %s2130_s22 = scalar_lea.sflag [#allocation4], %s2129_s8 }
 0x955   : > { %p2956_p3 = pnand %p4337_p4, %p4336_p11 }
 0x957   : > { %3407 = dma.done.wait (!%p2956_p3), %s2130_s22, 128  }
 0x958   : > { %3409 = vsyncadd (!%p2956_p3), %s2130_s22, 4294967168  ;;  %s4338_s11 = sld [smem:[#allocation15_spill]]  ;;  %s4339_s17 = sld [smem:[#allocation16_spill]] }
 0x959   : > { %p23_p5 = scmp.ge.s32.totalorder %s3488_s21, 4   ;;  %s4340_s15 = smov %s3416_s16 }
 0x95a   : > { %s4342_s18 = smov %s3488_s21 }
 0x95b   :  { %25 = sbr.rel (!%p23_p5) target bundleno = 12 (0xc), region = 118 }
 0x95e   : > { %s4341_s16 = smov %s4338_s11 }
 0x962   :  { %2135 = vsyncpa [#allocation3], 1 }
 0x963   :  { %2137 = vsyncpa [#allocation3 + $0x1], 1 }
 0x964   :  { %2138 = vsyncpa [#allocation6], 1 }
 0x965   :  { %2140 = vsyncpa [#allocation6 + $0x1], 1 }
 0x966   :  { %2141 = vsyncpa [#allocation9], 1 }
 0x967   :  { %2143 = vsyncpa [#allocation9 + $0x1], 1 }
 0x968   :  { %2144 = vsyncpa [#allocation4], 1 }
 0x969   :  { %2146 = vsyncpa [#allocation4 + $0x1], 1 }

</bundles_post_ra>
